<compile_context>
chip_gen: v7x
topology: tpu7x:2x2x1
jax: 0.10.0
libtpu: 0.0.40
codegen_flags: <defaults>
</compile_context>

<pallas_src>
import jax
import jax.numpy as jnp
from jax import lax
from jax.experimental import pallas as pl
from jax.experimental.pallas import tpu as pltpu


# ----------------------------------------------------------------------------
# One-time parameter transform (do NOT redo per forward call).
# ----------------------------------------------------------------------------

def make_deconv_params(w_pt, bias, gamma, beta):
    """w_pt: (Cin, Cout, 6, 6) PyTorch ConvTranspose2d weight; bias/gamma/beta: (Cout,)."""
    Cin, Cout, K, K2 = w_pt.shape
    assert (K, K2) == (6, 6), "DeconvBlock spec is kernel=6, stride=2, padding=2"
    G = 4 * Cout                       # matmul columns ordered (phase_y, phase_x, cout)
    Kd = 9 * Cin                       # real contraction depth (3x3 taps x Cin)
    KP = ((Kd + 127) // 128) * 128     # lane-/sublane-aligned contraction depth

    # Phase decomposition of the transposed conv:
    #   out[n, 2r+py, 2c+px, co] =
    #     sum_{ty,tx,ci} x_pad[n, r+ty, c+tx, ci] * w_pt[ci, co, py + 2*(2-ty), px + 2*(2-tx)]
    row_blocks = []
    for ty in range(3):
        for tx in range(3):
            cols = [w_pt[:, :, py + 2 * (2 - ty), px + 2 * (2 - tx)]
                    for py in range(2) for px in range(2)]          # each (Cin, Cout)
            row_blocks.append(jnp.concatenate(cols, axis=1))        # (Cin, G)
    w_mat = jnp.concatenate(row_blocks, axis=0).astype(jnp.float32)  # (Kd, G)
    # bf16 MXU operands (f32 accumulation happens in the kernel); zero-pad depth to KP.
    w_mat = jnp.pad(w_mat, ((0, KP - Kd), (0, 0))).astype(jnp.bfloat16)

    b_row = jnp.tile(bias.astype(jnp.float32), 4).reshape(1, G)      # bias per phase col
    return {"w_mat": w_mat, "b_row": b_row,
            "gamma": gamma.astype(jnp.float32), "beta": beta.astype(jnp.float32)}


# ----------------------------------------------------------------------------
# Pass 1: phase-decomposed conv as one deep bf16 MXU matmul per tile + BN partial stats.
# ----------------------------------------------------------------------------

def _conv_stats_kernel(p_ref, w_ref, b_ref, y_ref, s_ref):
    """p_ref: (1, TH, W, KP) bf16 im2col patches (lane-dense, zero-padded depth)
       w_ref: (KP, G)        bf16 phase-decomposed weights, G = 4*Cout
       b_ref: (1, G)         f32  conv bias tiled over the 4 phases
       y_ref: (1, TH, W, G)  f32  pre-BN conv output for this tile
       s_ref: (1, 1, 2, G)   f32  per-column [sum ; sum of squares] for this tile
    """
    _, TH, W, KP = p_ref.shape
    G = w_ref.shape[1]
    rows = TH * W

    patches = p_ref[...].reshape(rows, KP)                 # leading-dim collapse only
    # Single deep MXU contraction: bf16 LHS/RHS, f32 accumulation, fused bias add.
    y = jnp.dot(patches, w_ref[...],
                preferred_element_type=jnp.float32) + b_ref[...]          # (rows, G)

    y_ref[...] = y.reshape(1, TH, W, G)

    # Both BN moments in one traversal while y is still live (stats stay f32).
    col_sum = jnp.sum(y, axis=0, keepdims=True)            # (1, G)
    col_sq = jnp.sum(y * y, axis=0, keepdims=True)         # (1, G)
    s_ref[...] = jnp.concatenate([col_sum, col_sq], axis=0).reshape(1, 1, 2, G)


# ----------------------------------------------------------------------------
# Pass 2: fused BatchNorm affine + ReLU + sub-pixel interleave (lane slice + two stores,
# no in-kernel transposes / minor-dim reshapes).
# ----------------------------------------------------------------------------

def _bn_relu_interleave_kernel(y_ref, sc_ref, sh_ref, o_ref):
    """y_ref : (1, TH, W, G)         f32 pre-BN conv tile, columns (py, px, co)
       sc_ref: (1, G)                f32 per-column BN scale
       sh_ref: (1, G)                f32 per-column BN shift
       o_ref : (1, TH, 2, W, 2*Cout) f32 output tile; its row-major order equals the
                                     NHWC (2*TH, 2*W, Cout) tile, so the wrapper's
                                     depth-to-space is a free reshape.
    """
    G = y_ref.shape[3]
    half = G // 2                                           # (px, co) group for one py
    scale = sc_ref[...].reshape(1, 1, 1, G)
    shift = sh_ref[...].reshape(1, 1, 1, G)
    z = jnp.maximum(y_ref[...] * scale + shift, 0.0)        # (1, TH, W, G)
    o_ref[:, :, 0, :, :] = z[:, :, :, :half]                # phase_y = 0 output rows
    o_ref[:, :, 1, :, :] = z[:, :, :, half:]                # phase_y = 1 output rows


# ----------------------------------------------------------------------------
# Forward wrapper (jitted).  Matches PyTorch DeconvBlock with train-mode BatchNorm.
# ----------------------------------------------------------------------------

@jax.jit
def deconv_block_forward(x_nchw, params):
    """x_nchw: (N, Cin, H, W) -> (N, Cout, 2H, 2W)."""
    w_mat = params["w_mat"]                    # (KP, G) bf16
    b_row = params["b_row"]                    # (1, G)  f32
    gamma = params["gamma"]                    # (Cout,) f32
    beta = params["beta"]                      # (Cout,) f32

    N, Cin, H, W = x_nchw.shape
    KP, G = w_mat.shape
    Cout = gamma.shape[0]
    assert G == 4 * Cout
    Kd = 9 * Cin
    assert KP >= Kd, "params were built for a different Cin"

    # Row-tile height: re-derive against per-generation VMEM for production shapes
    # (v7x's 64 MiB per TensorCore is the binding budget).
    TH = 8 if (H % 8 == 0) else H
    HT = H // TH

    # --- lane-dense im2col patches (bf16), built once per call in XLA --------------
    x = jnp.transpose(x_nchw, (0, 2, 3, 1)).astype(jnp.bfloat16)          # NHWC
    xp = jnp.pad(x, ((0, 0), (1, 1), (1, 1), (0, 0)))                     # (N, H+2, W+2, Cin)
    taps = [xp[:, ty:ty + H, tx:tx + W, :] for ty in range(3) for tx in range(3)]
    patches = jnp.concatenate(taps, axis=-1)                              # (N, H, W, 9*Cin)
    patches = jnp.pad(patches, ((0, 0), (0, 0), (0, 0), (0, KP - Kd)))    # (N, H, W, KP)

    cparams = pltpu.CompilerParams(
        dimension_semantics=("parallel", "parallel"),   # both TCs busy on v7x
        vmem_limit_bytes=64 * 1024 * 1024)              # retune per generation at scale

    # --- pass 1: conv matmul + per-tile BN partial stats ---------------------------
    y_pre, stats = pl.pallas_call(
        _conv_stats_kernel,
        grid=(N, HT),
        in_specs=[
            pl.BlockSpec((1, TH, W, KP), lambda n, t: (n, t, 0, 0)),
            pl.BlockSpec((KP, G), lambda n, t: (0, 0)),
            pl.BlockSpec((1, G), lambda n, t: (0, 0)),
        ],
        out_specs=(
            pl.BlockSpec((1, TH, W, G), lambda n, t: (n, t, 0, 0)),
            pl.BlockSpec((1, 1, 2, G), lambda n, t: (n, t, 0, 0)),
        ),
        out_shape=(
            jax.ShapeDtypeStruct((N, H, W, G), jnp.float32),   # pre-BN conv (f32; bf16 ok
            jax.ShapeDtypeStruct((N, HT, 2, G), jnp.float32),  #  if downstream tolerates)
        ),
        compiler_params=cparams,
    )(patches, w_mat, b_row)

    # --- tiny per-channel BN reduction (train-mode batch stats, f32) ---------------
    col = jnp.sum(stats, axis=(0, 1))                          # (2, G)
    ch_sum = jnp.sum(col[0].reshape(4, Cout), axis=0)          # pool the 4 phase groups
    ch_sq = jnp.sum(col[1].reshape(4, Cout), axis=0)
    cnt = jnp.float32(N * (2 * H) * (2 * W))
    mean = ch_sum / cnt
    # NOTE: E[y^2] - E[y]^2 in f32 can dip slightly negative for large means; clamp.
    var = jnp.maximum(ch_sq / cnt - mean * mean, 0.0)          # biased (train-mode) var
    inv = lax.rsqrt(var + 1e-5)
    scale_c = inv * gamma
    shift_c = beta - mean * scale_c
    scale_g = jnp.tile(scale_c, 4).reshape(1, G)               # per (py, px, co) column
    shift_g = jnp.tile(shift_c, 4).reshape(1, G)

    # --- pass 2: BN affine + ReLU + phase interleave, final layout written once ----
    out5 = pl.pallas_call(
        _bn_relu_interleave_kernel,
        grid=(N, HT),
        in_specs=[
            pl.BlockSpec((1, TH, W, G), lambda n, t: (n, t, 0, 0)),
            pl.BlockSpec((1, G), lambda n, t: (0, 0)),
            pl.BlockSpec((1, G), lambda n, t: (0, 0)),
        ],
        out_specs=pl.BlockSpec((1, TH, 2, W, 2 * Cout), lambda n, t: (n, t, 0, 0, 0)),
        out_shape=jax.ShapeDtypeStruct((N, H, 2, W, 2 * Cout), jnp.float32),
        compiler_params=cparams,
    )(y_pre, scale_g, shift_g)

    # Free, row-major-preserving reshape to NHWC (no data movement), then one transpose
    # to NCHW only to match the PyTorch interface (keep NHWC downstream to skip it).
    out_nhwc = out5.reshape(N, 2 * H, 2 * W, Cout)
    return jnp.transpose(out_nhwc, (0, 3, 1, 2))


# ----------------------------------------------------------------------------
# Pure-JAX f32 reference (semantic spec of the PyTorch module, train-mode BN).
# ----------------------------------------------------------------------------

def _reference_forward(x_nchw, w_pt, bias, gamma, beta):
    K = w_pt.shape[2]
    w_oihw = jnp.transpose(w_pt[:, :, ::-1, ::-1], (1, 0, 2, 3))          # (Cout,Cin,K,K)
    y = lax.conv_general_dilated(
        x_nchw, w_oihw, window_strides=(1, 1),
        padding=((K - 1 - 2, K - 1 - 2), (K - 1 - 2, K - 1 - 2)),
        lhs_dilation=(2, 2),
        dimension_numbers=("NCHW", "OIHW", "NCHW"))
    y = y + bias.reshape(1, -1, 1, 1)
    mean = y.mean(axis=(0, 2, 3), keepdims=True)
    var = ((y - mean) ** 2).mean(axis=(0, 2, 3), keepdims=True)
    yn = (y - mean) * lax.rsqrt(var + 1e-5)
    yn = yn * gamma.reshape(1, -1, 1, 1) + beta.reshape(1, -1, 1, 1)
    return jnp.maximum(yn, 0.0)


# ----------------------------------------------------------------------------

if __name__ == "__main__":
    N, din, dout, H, W = 2, 4, 8, 16, 16

    key = jax.random.PRNGKey(0)
    kw, kb, kg, kbe, kx = jax.random.split(key, 5)
    w_pt = jax.random.normal(kw, (din, dout, 6, 6), jnp.float32) * 0.1    # ConvTranspose2d weight
    bias = jax.random.normal(kb, (dout,), jnp.float32) * 0.1
    gamma = 1.0 + jax.random.normal(kg, (dout,), jnp.float32) * 0.1       # BN weight
    beta = jax.random.normal(kbe, (dout,), jnp.float32) * 0.1             # BN bias
    x = jax.random.normal(kx, (N, din, H, W), jnp.float32)

    params = make_deconv_params(w_pt, bias, gamma, beta)                  # one-time transform
    out = jax.block_until_ready(deconv_block_forward(x, params))
    assert out.shape == (N, dout, 2 * H, 2 * W), out.shape

    ref = jax.block_until_ready(_reference_forward(x, w_pt, bias, gamma, beta))
    # bf16 MXU operands -> compare against the f32 reference with a bf16-appropriate
    # tolerance (structural bugs show up as O(1) errors, far above this).
    max_err = float(jnp.abs(out - ref).max())
    assert jnp.allclose(out, ref, atol=5e-2, rtol=5e-2), max_err

    print("KERNEL_OK")
</pallas_src>

<mosaic_0001>
module attributes {stable_mosaic.version = 11 : i64} {
  func.func @_conv_stats_kernel(%arg0: i32, %arg1: i32, %arg2: memref<1x8x16x128xbf16, #tpu.memory_space<vmem>>, %arg3: memref<128x32xbf16, #tpu.memory_space<vmem>>, %arg4: memref<1x32xf32, #tpu.memory_space<vmem>>, %arg5: memref<1x8x16x32xf32, #tpu.memory_space<vmem>>, %arg6: memref<1x1x2x32xf32, #tpu.memory_space<vmem>>) attributes {dimension_semantics = [#tpu.dimension_semantics<parallel>, #tpu.dimension_semantics<parallel>], iteration_bounds = array<i64: 2, 2>, scalar_prefetch = 0 : i64, scratch_operands = 0 : i64, tpu.core_type = #tpu.core_type<tc>, window_params = [{transform_indices = @transform_0, window_bounds = array<i64: 1, 8, 16, 128>}, {pipeline_mode = #tpu.pipeline_mode<synchronous>, transform_indices = @transform_1, window_bounds = array<i64: 128, 32>}, {pipeline_mode = #tpu.pipeline_mode<synchronous>, transform_indices = @transform_2, window_bounds = array<i64: 1, 32>}, {transform_indices = @transform_3, window_bounds = array<i64: 1, 8, 16, 32>}, {transform_indices = @transform_4, window_bounds = array<i64: 1, 1, 2, 32>}]} {
    %c0 = arith.constant 0 : index
    %c0_0 = arith.constant 0 : index
    %c0_1 = arith.constant 0 : index
    %c0_2 = arith.constant 0 : index
    %0 = vector.load %arg2[%c0, %c0_0, %c0_1, %c0_2] : memref<1x8x16x128xbf16, #tpu.memory_space<vmem>>, vector<1x8x16x128xbf16>
    %1 = vector.shape_cast %0 : vector<1x8x16x128xbf16> to vector<128x128xbf16>
    %c0_3 = arith.constant 0 : index
    %c0_4 = arith.constant 0 : index
    %2 = vector.load %arg3[%c0_3, %c0_4] : memref<128x32xbf16, #tpu.memory_space<vmem>>, vector<128x32xbf16>
    %cst = arith.constant dense<0.000000e+00> : vector<128x32xf32>
    %3 = tpu.matmul %1, %2, %cst {dimension_numbers = #tpu.dot_dimension_numbers<[1], [0], [0], [1], [0, 0, 1, 1], [], []>} : vector<128x128xbf16>, vector<128x32xbf16>, vector<128x32xf32> -> vector<128x32xf32>
    %c0_5 = arith.constant 0 : index
    %c0_6 = arith.constant 0 : index
    %4 = vector.load %arg4[%c0_5, %c0_6] : memref<1x32xf32, #tpu.memory_space<vmem>>, vector<1x32xf32>
    %5 = vector.broadcast %4 : vector<1x32xf32> to vector<128x32xf32>
    %6 = arith.addf %3, %5 : vector<128x32xf32>
    %7 = vector.shape_cast %6 : vector<128x32xf32> to vector<1x8x16x32xf32>
    %c0_7 = arith.constant 0 : index
    %c0_8 = arith.constant 0 : index
    %c0_9 = arith.constant 0 : index
    %c0_10 = arith.constant 0 : index
    %8 = vector.load %arg5[%c0_7, %c0_8, %c0_9, %c0_10] : memref<1x8x16x32xf32, #tpu.memory_space<vmem>>, vector<1x8x16x32xf32>
    tpu.vector_store %arg5[%c0_7, %c0_8, %c0_9, %c0_10], %7 {strides = array<i32>} : memref<1x8x16x32xf32, #tpu.memory_space<vmem>>, vector<1x8x16x32xf32>,
    %cst_11 = arith.constant dense<0.000000e+00> : vector<32xf32>
    %9 = vector.multi_reduction <add>, %6, %cst_11 [0] : vector<128x32xf32> to vector<32xf32>
    %10 = vector.shape_cast %9 : vector<32xf32> to vector<1x32xf32>
    %11 = arith.mulf %6, %6 : vector<128x32xf32>
    %cst_12 = arith.constant dense<0.000000e+00> : vector<32xf32>
    %12 = vector.multi_reduction <add>, %11, %cst_12 [0] : vector<128x32xf32> to vector<32xf32>
    %13 = vector.shape_cast %12 : vector<32xf32> to vector<1x32xf32>
    %14 = tpu.concatenate %10, %13 in 0 : vector<1x32xf32>, vector<1x32xf32> -> vector<2x32xf32>
    %15 = vector.shape_cast %14 : vector<2x32xf32> to vector<1x1x2x32xf32>
    %c0_13 = arith.constant 0 : index
    %c0_14 = arith.constant 0 : index
    %c0_15 = arith.constant 0 : index
    %c0_16 = arith.constant 0 : index
    %16 = vector.load %arg6[%c0_13, %c0_14, %c0_15, %c0_16] : memref<1x1x2x32xf32, #tpu.memory_space<vmem>>, vector<1x1x2x32xf32>
    tpu.vector_store %arg6[%c0_13, %c0_14, %c0_15, %c0_16], %15 {strides = array<i32>} : memref<1x1x2x32xf32, #tpu.memory_space<vmem>>, vector<1x1x2x32xf32>,
    return
  }
  func.func @transform_0(%arg0: i32, %arg1: i32) -> (i32, i32, i32, i32) {
    %c0_i32 = arith.constant 0 : i32
    %c0_i32_0 = arith.constant 0 : i32
    %c0_i32_1 = arith.constant 0 : i32
    return %arg0, %arg1, %c0_i32, %c0_i32_0 : i32, i32, i32, i32
  }
  func.func @transform_1(%arg0: i32, %arg1: i32) -> (i32, i32) {
    %c0_i32 = arith.constant 0 : i32
    %c0_i32_0 = arith.constant 0 : i32
    %c0_i32_1 = arith.constant 0 : i32
    return %c0_i32, %c0_i32_0 : i32, i32
  }
  func.func @transform_2(%arg0: i32, %arg1: i32) -> (i32, i32) {
    %c0_i32 = arith.constant 0 : i32
    %c0_i32_0 = arith.constant 0 : i32
    %c0_i32_1 = arith.constant 0 : i32
    return %c0_i32, %c0_i32_0 : i32, i32
  }
  func.func @transform_3(%arg0: i32, %arg1: i32) -> (i32, i32, i32, i32) {
    %c0_i32 = arith.constant 0 : i32
    %c0_i32_0 = arith.constant 0 : i32
    %c0_i32_1 = arith.constant 0 : i32
    return %arg0, %arg1, %c0_i32, %c0_i32_0 : i32, i32, i32, i32
  }
  func.func @transform_4(%arg0: i32, %arg1: i32) -> (i32, i32, i32, i32) {
    %c0_i32 = arith.constant 0 : i32
    %c0_i32_0 = arith.constant 0 : i32
    %c0_i32_1 = arith.constant 0 : i32
    return %arg0, %arg1, %c0_i32, %c0_i32_0 : i32, i32, i32, i32
  }
}

module attributes {stable_mosaic.version = 11 : i64} {
  func.func @_bn_relu_interleave_kernel(%arg0: i32, %arg1: i32, %arg2: memref<1x8x16x32xf32, #tpu.memory_space<vmem>>, %arg3: memref<1x32xf32, #tpu.memory_space<vmem>>, %arg4: memref<1x32xf32, #tpu.memory_space<vmem>>, %arg5: memref<1x8x2x16x16xf32, #tpu.memory_space<vmem>>) attributes {dimension_semantics = [#tpu.dimension_semantics<parallel>, #tpu.dimension_semantics<parallel>], iteration_bounds = array<i64: 2, 2>, scalar_prefetch = 0 : i64, scratch_operands = 0 : i64, tpu.core_type = #tpu.core_type<tc>, window_params = [{transform_indices = @transform_0, window_bounds = array<i64: 1, 8, 16, 32>}, {pipeline_mode = #tpu.pipeline_mode<synchronous>, transform_indices = @transform_1, window_bounds = array<i64: 1, 32>}, {pipeline_mode = #tpu.pipeline_mode<synchronous>, transform_indices = @transform_2, window_bounds = array<i64: 1, 32>}, {transform_indices = @transform_3, window_bounds = array<i64: 1, 8, 2, 16, 16>}]} {
    %c0 = arith.constant 0 : index
    %c0_0 = arith.constant 0 : index
    %0 = vector.load %arg3[%c0, %c0_0] : memref<1x32xf32, #tpu.memory_space<vmem>>, vector<1x32xf32>
    %1 = vector.shape_cast %0 : vector<1x32xf32> to vector<1x1x1x32xf32>
    %c0_1 = arith.constant 0 : index
    %c0_2 = arith.constant 0 : index
    %2 = vector.load %arg4[%c0_1, %c0_2] : memref<1x32xf32, #tpu.memory_space<vmem>>, vector<1x32xf32>
    %3 = vector.shape_cast %2 : vector<1x32xf32> to vector<1x1x1x32xf32>
    %c0_3 = arith.constant 0 : index
    %c0_4 = arith.constant 0 : index
    %c0_5 = arith.constant 0 : index
    %c0_6 = arith.constant 0 : index
    %4 = vector.load %arg2[%c0_3, %c0_4, %c0_5, %c0_6] : memref<1x8x16x32xf32, #tpu.memory_space<vmem>>, vector<1x8x16x32xf32>
    %5 = vector.broadcast %1 : vector<1x1x1x32xf32> to vector<1x8x16x32xf32>
    %6 = arith.mulf %4, %5 : vector<1x8x16x32xf32>
    %7 = vector.broadcast %3 : vector<1x1x1x32xf32> to vector<1x8x16x32xf32>
    %8 = arith.addf %6, %7 : vector<1x8x16x32xf32>
    %cst = arith.constant 0.000000e+00 : f32
    %9 = vector.broadcast %cst : f32 to vector<1x8x16x32xf32>
    %10 = arith.maximumf %8, %9 : vector<1x8x16x32xf32>
    %11 = vector.extract_strided_slice %10 {offsets = [0, 0, 0, 0], sizes = [1, 8, 16, 16], strides = [1, 1, 1, 1]} : vector<1x8x16x32xf32> to vector<1x8x16x16xf32>
    %c0_7 = arith.constant 0 : index
    %c0_8 = arith.constant 0 : index
    %c0_9 = arith.constant 0 : index
    %c0_10 = arith.constant 0 : index
    %c0_11 = arith.constant 0 : index
    %12 = vector.load %arg5[%c0_7, %c0_8, %c0_9, %c0_10, %c0_11] : memref<1x8x2x16x16xf32, #tpu.memory_space<vmem>>, vector<1x8x1x16x16xf32>
    %13 = vector.shape_cast %12 : vector<1x8x1x16x16xf32> to vector<1x8x16x16xf32>
    %14 = vector.shape_cast %11 : vector<1x8x16x16xf32> to vector<1x8x1x16x16xf32>
    tpu.vector_store %arg5[%c0_7, %c0_8, %c0_9, %c0_10, %c0_11], %14 {strides = array<i32>} : memref<1x8x2x16x16xf32, #tpu.memory_space<vmem>>, vector<1x8x1x16x16xf32>,
    %15 = vector.extract_strided_slice %10 {offsets = [0, 0, 0, 16], sizes = [1, 8, 16, 16], strides = [1, 1, 1, 1]} : vector<1x8x16x32xf32> to vector<1x8x16x16xf32>
    %c0_12 = arith.constant 0 : index
    %c0_13 = arith.constant 0 : index
    %c1 = arith.constant 1 : index
    %c0_14 = arith.constant 0 : index
    %c0_15 = arith.constant 0 : index
    %16 = vector.load %arg5[%c0_12, %c0_13, %c1, %c0_14, %c0_15] : memref<1x8x2x16x16xf32, #tpu.memory_space<vmem>>, vector<1x8x1x16x16xf32>
    %17 = vector.shape_cast %16 : vector<1x8x1x16x16xf32> to vector<1x8x16x16xf32>
    %18 = vector.shape_cast %15 : vector<1x8x16x16xf32> to vector<1x8x1x16x16xf32>
    tpu.vector_store %arg5[%c0_12, %c0_13, %c1, %c0_14, %c0_15], %18 {strides = array<i32>} : memref<1x8x2x16x16xf32, #tpu.memory_space<vmem>>, vector<1x8x1x16x16xf32>,
    return
  }
  func.func @transform_0(%arg0: i32, %arg1: i32) -> (i32, i32, i32, i32) {
    %c0_i32 = arith.constant 0 : i32
    %c0_i32_0 = arith.constant 0 : i32
    %c0_i32_1 = arith.constant 0 : i32
    return %arg0, %arg1, %c0_i32, %c0_i32_0 : i32, i32, i32, i32
  }
  func.func @transform_1(%arg0: i32, %arg1: i32) -> (i32, i32) {
    %c0_i32 = arith.constant 0 : i32
    %c0_i32_0 = arith.constant 0 : i32
    %c0_i32_1 = arith.constant 0 : i32
    return %c0_i32, %c0_i32_0 : i32, i32
  }
  func.func @transform_2(%arg0: i32, %arg1: i32) -> (i32, i32) {
    %c0_i32 = arith.constant 0 : i32
    %c0_i32_0 = arith.constant 0 : i32
    %c0_i32_1 = arith.constant 0 : i32
    return %c0_i32, %c0_i32_0 : i32, i32
  }
  func.func @transform_3(%arg0: i32, %arg1: i32) -> (i32, i32, i32, i32, i32) {
    %c0_i32 = arith.constant 0 : i32
    %c0_i32_0 = arith.constant 0 : i32
    %c0_i32_1 = arith.constant 0 : i32
    %c0_i32_2 = arith.constant 0 : i32
    return %arg0, %arg1, %c0_i32, %c0_i32_0, %c0_i32_1 : i32, i32, i32, i32, i32
  }
}

</mosaic_0001>

<bundles_post_ra>
// kernel: squeeze.2
= control target key start
LH: loop header
LB: loop body
LE: loop exit
PB: predicated region body
PF: predicated region fallthrough
CT: control target
= control target key end

     0   :  { %s37_s8 = smov 104   ;;  %vm7_vm0 = vcmask 64512   ;;  %s38_s9 = smov 112   ;;  %s55_s0 = inlined_call_operand.vmem [shape: f32[32], index: 0, kind: input, shape index: {}]   ;;  %s56_s1 = inlined_call_operand.vmem [shape: f32[4,8], index: 1, kind: output, shape index: {}]  }
   0x1   :  { %v4_v0 = vld [vmem:[%s55_s0] sm:$0x1]  ;;  %s36_s0 = smov 120  }
   0x2   :  { %5 = vst [vmem:[#allocation1] sm:$0x1] %v4_v0 }
   0x9   :  { %v9_v1 = vld [vmem:[#allocation1] sm:$0x1]  }
   0xa   :  { %v21_v2 = vld [vmem:[#allocation1] sm:$0x1]   ;;  %10 = vrot.lane.b32.xlu0 %v9_v1, %s36_s0 }
   0xb   :  { %22 = vrot.lane.b32.xlu1 %v21_v2, %s37_s8  ;;  %v6_v3 = vld [vmem:[#allocation1] sm:$0x1]  }
   0xc   :  { %v15_v4 = vld [vmem:[#allocation1] sm:$0x1]   ;;  %8 = vst.msk [vmem:[#allocation0] sm:$0x1] %vm7_vm0, %v6_v3  }
   0xe   :  { %16 = vrot.lane.b32.xlu0 %v15_v4, %s38_s9 }
  0x7c   :  { %v11_v5 = vpop.permute.xlu0 %10  }
  0x7d   :  { %v23_v6 = vpop.permute.xlu1 %22   ;;  %14 = vst.msk [vmem:[#allocation0 + $0x1] sm:$0x1] %vm7_vm0, %v11_v5  }
  0x7e   :  { %26 = vst.msk [vmem:[#allocation0 + $0x3] sm:$0x1] %vm7_vm0, %v23_v6  }
  0x80   :  { %v17_v7 = vpop.permute.xlu0 %16  }
  0x81   :  { %20 = vst.msk [vmem:[#allocation0 + $0x2] sm:$0x1] %vm7_vm0, %v17_v7  }
  0x88   :  { %v30_v8 = vld [vmem:[#allocation0] sm:$0xf] }
  0x89   :  { %32 = vst [vmem:[%s56_s1] sm:$0xf] %v30_v8 }

// kernel: tile.18
= control target key start
LH: loop header
LB: loop body
LE: loop exit
PB: predicated region body
PF: predicated region fallthrough
CT: control target
= control target key end

     0   :  { %s22_s0 = inlined_call_operand.vmem [shape: f32[8], index: 0, kind: input, shape index: {}]   ;;  %s23_s1 = inlined_call_operand.vmem [shape: f32[4,8], index: 1, kind: output, shape index: {}]  }
   0x1   :  { %v4_v0 = vld [vmem:[%s22_s0] ss:$0 sm:$0xff] }
   0x2   :  { %5 = vst [vmem:[%s23_s1] sm:$0xf] %v4_v0 }

// kernel: tile.19
= control target key start
LH: loop header
LB: loop body
LE: loop exit
PB: predicated region body
PF: predicated region fallthrough
CT: control target
= control target key end

     0   :  { %s101_s0 = inlined_call_operand.vmem [shape: f32[4,8], index: 0, kind: input, shape index: {}]   ;;  %s102_s1 = inlined_call_operand.hbm [shape: f32[1,32], index: 1, kind: output, shape index: {}]  }
   0x1   :  { %v5_v0 = vld [vmem:[%s101_s0] sm:$0xf] }
   0x2   :  { %6 = vst [vmem:[#allocation3] sm:$0xf] %v5_v0 }
   0x3   :  { %2 = vsyncpa [#allocation1], 0  ;;  %vm8_vm0 = vcmask 64512   ;;  %s72_s0 = smov 24   ;;  %s73_s8 = smov 8   ;;  %vm14_vm1 = vcmask 261312  }
   0x4   :  { %s74_s9 = smov 16   ;;  %vm20_vm2 = vcmask 195712   ;;  %vm26_vm3 = vcmask 130112   ;;  %s75_s10 = smov [#allocation0]  }
   0x5   :  { %s38_s11 = sshll.u32 %s75_s10, 4  ;;  %s39_s11 = int_to_ptr.vmem [resolvable:$true] %s38_s11 }
   0x6   :  { %s48_s12 = scalar_lea.vmem %s39_s11, 16  ;;  %s52_s13 = scalar_lea.vmem %s39_s11, 32 }
   0x7   :  { %p49_p0 = scmp.ne.s32.totalorder %s39_s11, %s48_s12  ;;  %p53_p1 = scmp.lt.s32.totalorder %s39_s11, %s39_s11 }
   0x8   :  { %p54_p2 = scmp.lt.s32.totalorder %s52_s13, %s48_s12 }
   0x9   :  { %v11_v1 = vld [vmem:[#allocation3 + $0x3] sm:$0x1]   ;;  %v23_v2 = vld [vmem:[#allocation3 + $0x1] sm:$0x1]   ;;  %v7_v3 = vld [vmem:[#allocation3] sm:$0x1]  }
   0xa   :  { %12 = vrot.lane.b32.xlu0 %v11_v1, %s72_s0  ;;  %24 = vrot.lane.b32.xlu1 %v23_v2, %s73_s8  ;;  %v17_v4 = vld [vmem:[#allocation3 + $0x2] sm:$0x1]   ;;  %9 = vst.msk [vmem:[#allocation2] sm:$0x1] %vm8_vm0, %v7_v3   ;;  %p55_p3 = por %p54_p2, %p53_p1 }
   0xc   :  { %p56_p4 = pnand %p55_p3, %p49_p0 }
   0xe   :  { %18 = vrot.lane.b32.xlu0 %v17_v4, %s74_s9 }
  0x7c   :  { %v13_v5 = vpop.permute.xlu0 %12   ;;  %v25_v6 = vpop.permute.xlu1 %24  }
  0x7d   :  { %15 = vst.msk [vmem:[#allocation2] sm:$0x1] %vm14_vm1, %v13_v5  }
  0x80   :  { %v19_v7 = vpop.permute.xlu0 %18  }
  0x81   :  { %21 = vst.msk [vmem:[#allocation2] sm:$0x1] %vm20_vm2, %v19_v7  }
  0x82   :  { %27 = vst.msk [vmem:[#allocation2] sm:$0x1] %vm26_vm3, %v25_v6  }
  0x89   :  { %v31_v8 = vld [vmem:[#allocation2] sm:$0x1] }
  0x8a   :  { %33 = vst [vmem:[#allocation0] sm:$0x1] %v31_v8 }
  0x8b   :  { %59 = shalt.err (!%p56_p4)
}
  0x8c   :  { %s60_s16 = scalar_lea.hbm %s102_s1, 16 }
  0x8d   :  { %p61_p5 = scmp.ne.s32.totalorder %s102_s1, %s60_s16  ;;  %p64_p6 = scmp.lt.u32.totalorder %s60_s16, %s102_s1 }
  0x8f   :  { %p66_p7 = pnand %p64_p6, %p61_p5 }
  0x91   :  { %69 = shalt.err (!%p66_p7)
}
  0x92   :  { %41 = dma.vmem_to_hbm [thread:$0]  %s39_s11, 16, %s102_s1, [#allocation1]  }
  0x93   :  { %70 = dma.done.wait [#allocation1], 16  }
  0x94   :  { %71 = vsyncadd [#allocation1], 4294967280 }
  0x95   :  { %43 = vsyncpa [#allocation1], 1 }

// kernel: deconv_block_forward.3
= control target key start
LH: loop header
LB: loop body
LE: loop exit
PB: predicated region body
PF: predicated region fallthrough
CT: control target
= control target key end

     0   :  { %s1320_s0 = inlined_call_operand.hbm [shape: f32[2,16,16,32], index: 0, kind: input, shape index: {}]   ;;  %s1321_s1 = inlined_call_operand.hbm [shape: f32[1,32], index: 1, kind: input, shape index: {}]   ;;  %s1322_s2 = inlined_call_operand.hbm [shape: f32[1,32], index: 2, kind: input, shape index: {}]   ;;  %s1323_s3 = inlined_call_operand.hbm [shape: f32[2,16,2,16,16], index: 3, kind: output, shape index: {}]  }
   0x1   :  { %1332 = sst [smem:[#allocation14_spill]] %s1321_s1 }
   0x2   :  { %1333 = sst [smem:[#allocation15_spill]] %s1322_s2 }
   0x3   :  { %8 = vsyncpa [#allocation3], 0 }
   0x4   :  { %10 = vsyncpa [#allocation3 + $0x1], 0 }
   0x5   :  { %11 = vsyncpa [#allocation6], 0 }
   0x6   :  { %12 = vsyncpa [#allocation4], 0 }
   0x7   :  { %14 = vsyncpa [#allocation4 + $0x1], 0  ;;  %s903_s12 = smov 0   ;;  %s905_s13 = smov 0  }
   0x8   :  { %s907_s14 = smov 0   ;;  %s909_s15 = smov 0  }
   0x9   :  { %s911_s16 = smov 0   ;;  %s913_s17 = smov 0  }
   0xa   :  { %s915_s18 = smov 0   ;;  %s917_s19 = smov 0  }
   0xb LB: > { %1334 = sst [smem:[#allocation12_spill]] %s864_s17  ;;  %s537_s20 = sadd.s32 4294967295, %s872_s19   ;;  %s872_s19 = sphi %s917_s19, %s20_s19   ;;  %s868_s18 = sphi %s915_s18, %s1359_s18   ;;  %s864_s17 = sphi %s913_s17, %s1354_s17   ;;  %s860_s16 = sphi %s911_s16, %s1358_s16   ;;  %s856_s15 = sphi %s909_s15, %s1353_s15   ;;  %s852_s14 = sphi %s907_s14, %s1357_s14   ;;  %s848_s13 = sphi %s905_s13, %s1356_s13   ;;  %s844_s12 = sphi %s903_s12, %s1355_s12  }
   0xc   : > { %s538_s21 = sadd.s32 4294967294, %s872_s19   ;;  %p48_p0 = scmp.ne.s32.totalorder %s852_s14, %s848_s13 }
   0xd   : > { %p49_p1 = scmp.eq.s32.totalorder %s872_s19, 0  ;;  %p54_p2 = scmp.ne.s32.totalorder %s848_s13, %s844_s12 }
   0xe   : > { %p951_p3 = scmp.eq.s32.totalorder %s537_s20, 0  ;;  %p122_p4 = scmp.eq.s32.totalorder %s537_s20, 3 }
   0xf   : > { %p955_p5 = por %p49_p1, %p48_p0  ;;  %p128_p6 = scmp.eq.s32.totalorder %s538_s21, 3 }
  0x10   : > { %s1335_s23 = scalar_select %p951_p3, 1, 0 }
  0x11   : > { %p961_p7 = por %p951_p3, %p54_p2  ;;  %p965_p8 = por %p122_p4, %p48_p0 }
  0x12   : > { %p969_p9 = por %p128_p6, %p54_p2  ;;  %p539_p10 = scmp.ge.s32.totalorder %s872_s19, 1 }
  0x13   : > { %s1337_s25 = scalar_select %p961_p7, 1, 0 }
  0x14   : > { %s1338_s26 = scalar_select %p965_p8, 1, 0 }
  0x15   : > { %s1339_s27 = scalar_select %p969_p9, 1, 0 }
  0x16   : > { %p135_p11 = scmp.lt.s32.totalorder %s872_s19, 5  ;;  %s874_s29 = smov [#allocation5]  }
  0x17   : > { %s148_s30 = sshll.u32 %s874_s29, 4  ;;  %p609_p13 = scmp.lt.s32.totalorder %s872_s19, 4  ;;  %s149_s30 = int_to_ptr.vmem [resolvable:$true] %s148_s30 }
  0x18   : > { %p975_p12 = pnand %p539_p10, %p135_p11  ;;  %s875_s5 = smov [#allocation7]  }
  0x19   : > { %p984_p1 = pnand %p609_p13, %p955_p5  ;;  %s159_s6 = sshll.u32 %s875_s5, 4  ;;  %s994_s6 = int_to_ptr.vmem [resolvable:$true] %s159_s6 }
  0x1a   : > { %s1340_s28 = scalar_select %p975_p12, 1, 0 }
  0x1b   : > { %p592_p0 = pneg %p975_p12  ;;  %s1343_s1 = sld [smem:[#allocation14_spill]] }
  0x1c   : > { %s1341_s4 = scalar_select %p984_p1, 1, 0 }
  0x1d   : > { %p990_p2 = pnand %p592_p0, %p951_p3 }
  0x1f   : > { %p686_p5 = pneg %p990_p2 }
  0x21   : > { %s684_s10 = scalar_lea.hbm %s1343_s1, 16 }
  0x22   : > { %p685_p4 = scmp.ne.s32.totalorder %s1343_s1, %s684_s10  ;;  %p691_p11 = scmp.lt.u32.totalorder %s684_s10, %s1343_s1 }
  0x24   : > { %p687_p6 = pnand %p686_p5, %p685_p4 }
  0x26   : > { %p688_p10 = pneg %p687_p6 }
  0x28   : > { %p693_p13 = pnand %p691_p11, %p688_p10 }
  0x2a   : > { %696 = shalt.err (!%p693_p13)
}
  0x2b   : > { %s697_s29 = scalar_lea.vmem %s149_s30, 16  ;;  %s704_s5 = scalar_lea.vmem %s149_s30, 32 }
  0x2c   : > { %p698_p0 = scmp.ne.s32.totalorder %s149_s30, %s697_s29  ;;  %p705_p3 = scmp.lt.s32.totalorder %s149_s30, %s149_s30 }
  0x2d   : > { %p706_p7 = scmp.lt.s32.totalorder %s704_s5, %s697_s29 }
  0x2e   : > { %p700_p9 = pnand %p698_p0, %p686_p5 }
  0x2f   : > { %p707_p12 = por %p706_p7, %p705_p3 }
  0x30   : > { %p701_p8 = pneg %p700_p9 }
  0x32   : > { %p708_p1 = pnand %p707_p12, %p701_p8 }
  0x34   : > { %711 = shalt.err (!%p708_p1)
}
  0x35   : > { %595 = dma.hbm_to_vmem [thread:$0]  (!%p990_p2), %s1343_s1, 16, %s149_s30, [#allocation6]  }
  0x36   : > { %s1344_s2 = sld [smem:[#allocation15_spill]] }
  0x3c   : > { %s712_s20 = scalar_lea.hbm %s1344_s2, 16 }
  0x3d   : > { %p713_p9 = scmp.ne.s32.totalorder %s1344_s2, %s712_s20  ;;  %p719_p8 = scmp.lt.u32.totalorder %s712_s20, %s1344_s2 }
  0x3f   : > { %p715_p3 = pnand %p713_p9, %p686_p5 }
  0x41   : > { %p716_p7 = pneg %p715_p3 }
  0x43   : > { %p721_p12 = pnand %p719_p8, %p716_p7 }
  0x45   : > { %724 = shalt.err (!%p721_p12)
}
  0x46   : > { %s725_s30 = scalar_lea.vmem %s994_s6, 16  ;;  %s732_s8 = scalar_lea.vmem %s994_s6, 32 }
  0x47   : > { %p726_p1 = scmp.ne.s32.totalorder %s994_s6, %s725_s30  ;;  %p733_p10 = scmp.lt.s32.totalorder %s994_s6, %s994_s6 }
  0x48   : > { %p734_p11 = scmp.lt.s32.totalorder %s732_s8, %s725_s30 }
  0x49   : > { %p728_p4 = pnand %p726_p1, %p686_p5 }
  0x4a   : > { %p735_p13 = por %p734_p11, %p733_p10 }
  0x4b   : > { %p729_p6 = pneg %p728_p4 }
  0x4d   : > { %p736_p0 = pnand %p735_p13, %p729_p6 }
  0x4f   : > { %739 = shalt.err (!%p736_p0)
}
  0x50   : > { %598 = dma.hbm_to_vmem [thread:$0]  (!%p990_p2), %s1344_s2, 16, %s994_s6, [#allocation6]  }
  0x51   : > { %s29_s11 = sadd.s32 1, %s864_s17  ;;  %s32_s20 = sadd.s32 1, %s868_s18 }
  0x52   : > { %p30_p5 = scmp.ge.s32.totalorder %s29_s11, 2  ;;  %s170_s21 = sand.u32 1, %s852_s14  }
  0x53   : > { %s543_s24 = sshll.u32 %s170_s21, 7  ;;  %s578_s29 = sshll.u32 %s864_s17, 4 }
  0x54   : > { %s1361_s11 = smov (%p30_p5, %s29_s11), 0  ;;  %s1363_s20 = smov (!%p30_p5, %s32_s20), %s868_s18 }
  0x55   : > { %1345 = sst [smem:[#allocation13_spill]] %s1361_s11  ;;  %s37_s7 = ssub.s32 %s864_s17, %s1361_s11 }
  0x56   : > { %p34_p9 = scmp.ge.s32.totalorder %s1363_s20, 2  ;;  %s546_s5 = sshll.u32 %s868_s18, 5 }
  0x57   : > { %s174_s30 = scalar_lea.vmem [#allocation2], %s543_s24  ;;  %s181_s8 = sadd.s32 %s578_s29, %s546_s5 }
  0x58   : > { %s184_s6 = sshll.u32 %s174_s30, 4  ;;  %s1365_s20 = smov (%p34_p9, %s1363_s20), 0  ;;  %s1056_s6 = int_to_ptr.vmem [resolvable:$true] %s184_s6 }
  0x59   : > { %s36_s9 = ssub.s32 %s868_s18, %s1365_s20  ;;  %s547_s10 = sshll.u32 %s181_s8, 7 }
  0x5a   : > { %s38_s22 = sor.u32 %s37_s7, %s36_s9  ;;  %s1063_s11 = scalar_lea.hbm %s1320_s0, %s547_s10 }
  0x5b   : > { %p39_p2 = scmp.eq.s32.totalorder %s38_s22, 0  ;;  %s1346_s24 = sadd.s32 1, %s852_s14 }
  0x5c   : > { %s1070_s17 = scalar_lea.sflag [#allocation3], %s170_s21  ;;  %s740_s29 = scalar_lea.hbm %s1063_s11, 2048 }
  0x5d   : > { %s1068_s30 = scalar_select %p39_p2, %s852_s14, %s1346_s24  }
  0x5e   : > { %p741_p3 = scmp.ne.s32.totalorder %s1063_s11, %s740_s29  ;;  %p1347_p7 = scmp.ne.s32.totalorder %s1341_s4, 0 }
  0x5f   : > { %s745_s7 = scalar_lea.hbm %s1320_s0, 8192  ;;  %p746_p4 = scmp.lt.u32.totalorder %s1063_s11, %s1320_s0 }
  0x60   : > { %p742_p8 = pneg %p1347_p7  ;;  %p747_p6 = scmp.lt.u32.totalorder %s745_s7, %s740_s29 }
  0x61   : > { %p749_p11 = scmp.lt.u32.totalorder %s740_s29, %s1063_s11 }
  0x62   : > { %p743_p12 = pnand %p742_p8, %p741_p3  ;;  %p748_p10 = por %p747_p6, %p746_p4 }
  0x64   : > { %p744_p1 = pneg %p743_p12  ;;  %p750_p13 = por %p749_p11, %p748_p10 }
  0x66   : > { %p751_p0 = pnand %p750_p13, %p744_p1 }
  0x68   : > { %754 = shalt.err (!%p751_p0)
}
  0x69   : > { %s755_s22 = scalar_lea.vmem %s1056_s6, 2048  ;;  %s876_s21 = smov [#allocation2]  }
  0x6a   : > { %p756_p5 = scmp.ne.s32.totalorder %s1056_s6, %s755_s22  ;;  %s760_s9 = sshll.u32 %s876_s21, 4  ;;  %s761_s9 = int_to_ptr.vmem [resolvable:$false] %s760_s9 }
  0x6b   : > { %s762_s10 = scalar_lea.vmem %s761_s9, 4096  ;;  %p763_p3 = scmp.lt.s32.totalorder %s1056_s6, %s761_s9 }
  0x6c   : > { %p758_p9 = pnand %p756_p5, %p742_p8  ;;  %p764_p12 = scmp.lt.s32.totalorder %s762_s10, %s755_s22 }
  0x6e   : > { %p759_p2 = pneg %p758_p9  ;;  %p765_p4 = por %p764_p12, %p763_p3 }
  0x70   : > { %p766_p6 = pnand %p765_p4, %p759_p2 }
  0x72   : > { %769 = shalt.err (!%p766_p6)
}
  0x73   : > { %s877_s24 = smov 128   ;;  %s878_s29 = smov 8  }
  0x74   : > { %602 = dma.hbm_to_vmem [thread:$0]  (!%p1347_p7), %s1063_s11, 2048, %s1056_s6, %s1070_s17, %s877_s24, %s877_s24, %s878_s29  }
  0x75   : > { %p1348_p8 = scmp.ne.s32.totalorder %s1340_s28, 0 }
  0x76   : > { %s1101_s1 = sand.u32 (!%p1348_p8), 1, %s848_s13   ;;  %p1349_p1 = scmp.ne.s32.totalorder (!%p1348_p8), %s1337_s25, 0 }
  0x77   : > { %196 = sbr.rel (%p1348_p8) target bundleno = 296 (0x128), region = 32  ;;  %s549_s2 = sshll.u32 (!%p1348_p8), %s1101_s1, 7 }
  0x78   : > { %s199_s7 = scalar_lea.sflag (!%p1348_p8), [#allocation3], %s1101_s1  ;;  %s1105_s5 = scalar_lea.vmem (!%p1348_p8), [#allocation2], %s549_s2 }
  0x7e   : > { %831 = dma.done.wait (%p1349_p1), %s199_s7, 2048  }
  0x7f   : > { %833 = vsyncadd (%p1349_p1), %s199_s7, 4294965248  ;;  %p1350_p7 = scmp.ne.s32.totalorder %s1335_s23, 0 }
  0x81   : > { %835 = dma.done.wait (%p1350_p7), [#allocation6], 32  }
  0x82   : > { %837 = vsyncadd (%p1350_p7), [#allocation6], 4294967264  ;;  %v1115_v0 = vld [vmem:[#allocation5] ss:$0 sm:$0xff]  ;;  %v1117_v1 = vld [vmem:[#allocation7] ss:$0 sm:$0xff] }
  0x83   : > { %v239_v2 = vld [vmem:[%s1105_s5 + $0x10] sm:$0xff]  ;;  %v237_v4 = vld [vmem:[%s1105_s5] sm:$0xff]  ;;  %v240_v5 = vld [vmem:[%s1105_s5 + $0x18] sm:$0xff]  ;;  %s552_s17 = sshll.u32 %s1101_s1, 8  ;;  %vm313_vm0 = vcmask 130048   ;;  %s879_s23 = smov 112  }
  0x84   : > { %v261_v3 = vmul.f32 %v1115_v0, %v239_v2  ;;  %v238_v6 = vld [vmem:[%s1105_s5 + $0x8] sm:$0xff]  ;;  %v259_v7 = vmul.f32 %v1115_v0, %v237_v4  ;;  %v262_v8 = vmul.f32 %v1115_v0, %v240_v5  ;;  %v241_v11 = vld [vmem:[%s1105_s5 + $0x20] sm:$0xff]  ;;  %v244_v12 = vld [vmem:[%s1105_s5 + $0x38] sm:$0xff]  ;;  %s1158_s25 = scalar_lea.vmem [#allocation8], %s552_s17  ;;  %s579_s28 = sshll.u32 %s856_s15, 5 }
  0x85   : > { %v260_v9 = vmul.f32 %v1115_v0, %v238_v6  ;;  %v242_v10 = vld [vmem:[%s1105_s5 + $0x28] sm:$0xff]  ;;  %v263_v15 = vmul.f32 %v1115_v0, %v241_v11  ;;  %v266_v16 = vmul.f32 %v1115_v0, %v244_v12  ;;  %v243_v17 = vld [vmem:[%s1105_s5 + $0x30] sm:$0xff]  ;;  %v245_v27 = vld [vmem:[%s1105_s5 + $0x40] sm:$0xff]  ;;  %s574_s4 = sshll.u32 %s860_s16, 6  ;;  %s428_s8 = sshll.u32 %s1158_s25, 4  ;;  %s1262_s8 = int_to_ptr.vmem [resolvable:$true] %s428_s8 }
  0x86   : > { %v283_v13 = vadd.f32 %v1117_v1, %v261_v3  ;;  %v264_v14 = vmul.f32 %v1115_v0, %v242_v10  ;;  %v281_v18 = vadd.f32 %v1117_v1, %v259_v7  ;;  %v284_v19 = vadd.f32 %v1117_v1, %v262_v8  ;;  %v246_v22 = vld [vmem:[%s1105_s5 + $0x48] sm:$0xff]  ;;  %v248_v28 = vld [vmem:[%s1105_s5 + $0x58] sm:$0xff]  ;;  %v247_v29 = vld [vmem:[%s1105_s5 + $0x50] sm:$0xff]  ;;  %s425_s11 = sadd.s32 %s579_s28, %s574_s4  ;;  %s412_s21 = scalar_lea.sflag [#allocation4], %s1101_s1 }
  0x87   : > { %v282_v20 = vadd.f32 %v1117_v1, %v260_v9  ;;  %v265_v21 = vmul.f32 %v1115_v0, %v243_v17  ;;  %v1143_v25 = vadd.f32 %v1117_v1, %v263_v15  ;;  %v1146_v26 = vadd.f32 %v1117_v1, %v266_v16  ;;  %v250_v34 = vld [vmem:[%s1105_s5 + $0x68] sm:$0xff]  ;;  %v249_v35 = vld [vmem:[%s1105_s5 + $0x60] sm:$0xff]  ;;  %v252_v36 = vld [vmem:[%s1105_s5 + $0x78] sm:$0xff]  ;;  %s575_s6 = sshll.u32 %s425_s11, 7  ;;  %s770_s9 = scalar_lea.vmem %s1262_s8, 4096 }
  0x88   : > { %v299_v23 = vmax.f32 %v283_v13, 0.0  ;;  %v286_v24 = vadd.f32 %v1117_v1, %v264_v14  ;;  %v297_v30 = vmax.f32 %v281_v18, 0.0  ;;  %v300_v31 = vmax.f32 %v284_v19, 0.0  ;;  %v251_v41 = vld [vmem:[%s1105_s5 + $0x70] sm:$0xff]  ;;  %s1260_s22 = scalar_lea.hbm %s1323_s3, %s575_s6  ;;  %p771_p10 = scmp.ne.s32.totalorder %s1262_s8, %s770_s9 }
  0x89   : > { %v298_v32 = vmax.f32 %v282_v20, 0.0  ;;  %v287_v33 = vadd.f32 %v1117_v1, %v265_v21  ;;  %v301_v38 = vmax.f32 %v1143_v25, 0.0  ;;  %v304_v39 = vmax.f32 %v1146_v26, 0.0  ;;  %p1351_p11 = scmp.ne.s32.totalorder %s1338_s26, 0  ;;  %s880_s10 = smov [#allocation8]  }
  0x8a   : > { %350 = vrot.lane.b32.xlu1 %v299_v23, %s879_s23  ;;  %316 = vst.msk [vmem:[%s1158_s25 + $0x20] sm:$0xff] %vm313_vm0, %v299_v23  ;;  %v302_v37 = vmax.f32 %v286_v24, 0.0  ;;  %v268_v40 = vmul.f32 %v1115_v0, %v246_v22  ;;  %346 = vrot.lane.b32.xlu0 %v297_v30, %s879_s23  ;;  %314 = vst.msk [vmem:[%s1158_s25] sm:$0xff] %vm313_vm0, %v297_v30  ;;  %v267_v43 = vmul.f32 %v1115_v0, %v245_v27  ;;  %s774_s24 = sshll.u32 %s880_s10, 4  ;;  %s775_s24 = int_to_ptr.vmem [resolvable:$false] %s774_s24 }
  0x8b   : > { %317 = vst.msk [vmem:[%s1158_s25 + $0x28] sm:$0xff] %vm313_vm0, %v300_v31  ;;  %315 = vst.msk [vmem:[%s1158_s25 + $0x8] sm:$0xff] %vm313_vm0, %v298_v32  ;;  %v303_v42 = vmax.f32 %v287_v33, 0.0  ;;  %v270_v44 = vmul.f32 %v1115_v0, %v248_v28  ;;  %v269_v45 = vmul.f32 %v1115_v0, %v247_v29  ;;  %v272_v47 = vmul.f32 %v1115_v0, %v250_v34  ;;  %p772_p13 = pnand %p771_p10, %p1351_p11  ;;  %s776_s29 = scalar_lea.vmem %s775_s24, 8192 }
  0x8c   : > { %319 = vst.msk [vmem:[%s1158_s25 + $0x48] sm:$0xff] %vm313_vm0, %v302_v37  ;;  %318 = vst.msk [vmem:[%s1158_s25 + $0x40] sm:$0xff] %vm313_vm0, %v301_v38  ;;  %v290_v46 = vadd.f32 %v1117_v1, %v268_v40  ;;  %v271_v48 = vmul.f32 %v1115_v0, %v249_v35  ;;  %v274_v49 = vmul.f32 %v1115_v0, %v252_v36  ;;  %p777_p5 = scmp.lt.s32.totalorder %s1262_s8, %s775_s24  ;;  %p778_p9 = scmp.lt.s32.totalorder %s776_s29, %s770_s9 }
  0x8d   : > { %321 = vst.msk [vmem:[%s1158_s25 + $0x68] sm:$0xff] %vm313_vm0, %v304_v39  ;;  %320 = vst.msk [vmem:[%s1158_s25 + $0x60] sm:$0xff] %vm313_vm0, %v303_v42  ;;  %v289_v50 = vadd.f32 %v1117_v1, %v267_v43  ;;  %v292_v51 = vadd.f32 %v1117_v1, %v270_v44  ;;  %v291_v52 = vadd.f32 %v1117_v1, %v269_v45  ;;  %p773_p0 = pneg %p772_p13 }
  0x8e   : > { %v273_v53 = vmul.f32 %v1115_v0, %v251_v41  ;;  %352 = vrot.lane.b32.xlu1 %v300_v31, %s879_s23  ;;  %v306_v54 = vmax.f32 %v290_v46, 0.0  ;;  %v294_v55 = vadd.f32 %v1117_v1, %v272_v47  ;;  %v293_v56 = vadd.f32 %v1117_v1, %v271_v48  ;;  %348 = vrot.lane.b32.xlu0 %v298_v32, %s879_s23  ;;  %p779_p2 = por %p778_p9, %p777_p5 }
  0x8f   : > { %v296_v57 = vadd.f32 %v1117_v1, %v274_v49  ;;  %v305_v58 = vmax.f32 %v289_v50, 0.0  ;;  %v308_v59 = vmax.f32 %v292_v51, 0.0  ;;  %v307_v60 = vmax.f32 %v291_v52, 0.0 }
  0x90   : > { %v295_v61 = vadd.f32 %v1117_v1, %v273_v53  ;;  %323 = vst.msk [vmem:[%s1158_s25 + $0x88] sm:$0xff] %vm313_vm0, %v306_v54  ;;  %v310_v62 = vmax.f32 %v294_v55, 0.0  ;;  %v309_v63 = vmax.f32 %v293_v56, 0.0  ;;  %p780_p3 = pnand %p779_p2, %p773_p0 }
  0x91   : > { %v312_v0 = vmax.f32 %v296_v57, 0.0  ;;  %322 = vst.msk [vmem:[%s1158_s25 + $0x80] sm:$0xff] %vm313_vm0, %v305_v58  ;;  %325 = vst.msk [vmem:[%s1158_s25 + $0xa8] sm:$0xff] %vm313_vm0, %v308_v59 }
  0x92   : > { %324 = vst.msk [vmem:[%s1158_s25 + $0xa0] sm:$0xff] %vm313_vm0, %v307_v60  ;;  %v311_v2 = vmax.f32 %v295_v61, 0.0  ;;  %356 = vrot.lane.b32.xlu1 %v302_v37, %s879_s23  ;;  %327 = vst.msk [vmem:[%s1158_s25 + $0xc8] sm:$0xff] %vm313_vm0, %v310_v62  ;;  %354 = vrot.lane.b32.xlu0 %v301_v38, %s879_s23 }
  0x93   : > { %326 = vst.msk [vmem:[%s1158_s25 + $0xc0] sm:$0xff] %vm313_vm0, %v309_v63  ;;  %329 = vst.msk [vmem:[%s1158_s25 + $0xe8] sm:$0xff] %vm313_vm0, %v312_v0 }
  0x94   : > { %328 = vst.msk [vmem:[%s1158_s25 + $0xe0] sm:$0xff] %vm313_vm0, %v311_v2 }
  0x96   : > { %360 = vrot.lane.b32.xlu1 %v304_v39, %s879_s23  ;;  %358 = vrot.lane.b32.xlu0 %v303_v42, %s879_s23 }
  0x9a   : > { %364 = vrot.lane.b32.xlu1 %v306_v54, %s879_s23  ;;  %362 = vrot.lane.b32.xlu0 %v305_v58, %s879_s23 }
  0x9e   : > { %368 = vrot.lane.b32.xlu1 %v308_v59, %s879_s23  ;;  %366 = vrot.lane.b32.xlu0 %v307_v60, %s879_s23 }
  0xa2   : > { %372 = vrot.lane.b32.xlu1 %v310_v62, %s879_s23  ;;  %370 = vrot.lane.b32.xlu0 %v309_v63, %s879_s23 }
  0xa6   : > { %376 = vrot.lane.b32.xlu1 %v312_v0, %s879_s23  ;;  %374 = vrot.lane.b32.xlu0 %v311_v2, %s879_s23 }
  0xfc   : > { %v351_v1 = vpop.permute.xlu1 %350  ;;  %v347_v3 = vpop.permute.xlu0 %346 }
  0xfd   : > { %557 = vst.msk [vmem:[%s1158_s25 + $0x30] sm:$0xff] %vm313_vm0, %v351_v1  ;;  %555 = vst.msk [vmem:[%s1158_s25 + $0x10] sm:$0xff] %vm313_vm0, %v347_v3 }
 0x100   : > { %v353_v4 = vpop.permute.xlu1 %352  ;;  %v349_v5 = vpop.permute.xlu0 %348 }
 0x101   : > { %558 = vst.msk [vmem:[%s1158_s25 + $0x38] sm:$0xff] %vm313_vm0, %v353_v4  ;;  %556 = vst.msk [vmem:[%s1158_s25 + $0x18] sm:$0xff] %vm313_vm0, %v349_v5 }
 0x104   : > { %v357_v6 = vpop.permute.xlu1 %356  ;;  %v355_v7 = vpop.permute.xlu0 %354 }
 0x105   : > { %560 = vst.msk [vmem:[%s1158_s25 + $0x58] sm:$0xff] %vm313_vm0, %v357_v6  ;;  %559 = vst.msk [vmem:[%s1158_s25 + $0x50] sm:$0xff] %vm313_vm0, %v355_v7 }
 0x108   : > { %v361_v8 = vpop.permute.xlu1 %360  ;;  %v359_v9 = vpop.permute.xlu0 %358 }
 0x109   : > { %562 = vst.msk [vmem:[%s1158_s25 + $0x78] sm:$0xff] %vm313_vm0, %v361_v8  ;;  %561 = vst.msk [vmem:[%s1158_s25 + $0x70] sm:$0xff] %vm313_vm0, %v359_v9 }
 0x10c   : > { %v365_v10 = vpop.permute.xlu1 %364  ;;  %v363_v11 = vpop.permute.xlu0 %362 }
 0x10d   : > { %564 = vst.msk [vmem:[%s1158_s25 + $0x98] sm:$0xff] %vm313_vm0, %v365_v10  ;;  %563 = vst.msk [vmem:[%s1158_s25 + $0x90] sm:$0xff] %vm313_vm0, %v363_v11 }
 0x110   : > { %v369_v12 = vpop.permute.xlu1 %368  ;;  %v367_v13 = vpop.permute.xlu0 %366 }
 0x111   : > { %566 = vst.msk [vmem:[%s1158_s25 + $0xb8] sm:$0xff] %vm313_vm0, %v369_v12  ;;  %565 = vst.msk [vmem:[%s1158_s25 + $0xb0] sm:$0xff] %vm313_vm0, %v367_v13 }
 0x114   : > { %v373_v14 = vpop.permute.xlu1 %372  ;;  %v371_v15 = vpop.permute.xlu0 %370 }
 0x115   : > { %568 = vst.msk [vmem:[%s1158_s25 + $0xd8] sm:$0xff] %vm313_vm0, %v373_v14  ;;  %567 = vst.msk [vmem:[%s1158_s25 + $0xd0] sm:$0xff] %vm313_vm0, %v371_v15 }
 0x118   : > { %v377_v16 = vpop.permute.xlu1 %376  ;;  %v375_v17 = vpop.permute.xlu0 %374 }
 0x119   : > { %570 = vst.msk [vmem:[%s1158_s25 + $0xf8] sm:$0xff] %vm313_vm0, %v377_v16  ;;  %569 = vst.msk [vmem:[%s1158_s25 + $0xf0] sm:$0xff] %vm313_vm0, %v375_v17 }
 0x11a   : > { %783 = shalt.err (!%p780_p3)
}
 0x11b   : > { %s784_s2 = scalar_lea.hbm %s1260_s22, 4096  ;;  %s788_s17 = scalar_lea.hbm %s1323_s3, 16384 }
 0x11c   : > { %p785_p12 = scmp.ne.s32.totalorder %s1260_s22, %s784_s2  ;;  %p789_p8 = scmp.lt.u32.totalorder %s1260_s22, %s1323_s3 }
 0x11d   : > { %p790_p1 = scmp.lt.u32.totalorder %s788_s17, %s784_s2  ;;  %p792_p10 = scmp.lt.u32.totalorder %s784_s2, %s1260_s22 }
 0x11e   : > { %p786_p4 = pnand %p785_p12, %p1351_p11 }
 0x11f   : > { %p791_p7 = por %p790_p1, %p789_p8 }
 0x120   : > { %p787_p6 = pneg %p786_p4 }
 0x121   : > { %p793_p13 = por %p792_p10, %p791_p7 }
 0x123   : > { %p794_p0 = pnand %p793_p13, %p787_p6 }
 0x125   : > { %797 = shalt.err (!%p794_p0)
}
 0x126   : > { %s881_s28 = smov 128   ;;  %s882_s4 = smov 8  }
 0x127   : > { %590 = dma.vmem_to_hbm [thread:$0]  (%p1351_p11), %s1262_s8, 4096, %s1260_s22, %s412_s21, %s881_s28, %s881_s28, %s882_s4  }
 0x128 PF: > { %p612_p5 = scmp.ge.s32.totalorder %s872_s19, 2  ;;  %s443_s11 = sand.u32 1, %s844_s12  }
 0x129   : > { %p1352_p9 = scmp.ne.s32.totalorder %s1339_s27, 0  ;;  %s444_s6 = scalar_lea.sflag [#allocation4], %s443_s11 }
 0x12b   : > { %p604_p2 = pnand %p612_p5, %p1352_p9 }
 0x12d   : > { %839 = dma.done.wait (!%p604_p2), %s444_s6, 4096  }
 0x12e   : > { %841 = vsyncadd (!%p604_p2), %s444_s6, 4294963200  ;;  %s20_s19 = sadd.s32 1, %s872_s19   ;;  %s1353_s15 = sld [smem:[#allocation12_spill]] }
 0x12f   : > { %p17_p3 = scmp.ge.s32.totalorder %s20_s19, 6   ;;  %s1354_s17 = sld [smem:[#allocation13_spill]] }
 0x130   : > { %s1355_s12 = smov %s848_s13  ;;  %s1356_s13 = smov %s852_s14 }
 0x131   : > { %s1357_s14 = smov %s1068_s30  ;;  %s1358_s16 = smov %s868_s18 }
 0x132   : > { %s1359_s18 = smov %s1365_s20  ;;  %19 = sbr.rel (!%p17_p3) target bundleno = 11 (0xb), region = 86 }
 0x139   :  { %449 = vsyncpa [#allocation3], 1 }
 0x13a   :  { %451 = vsyncpa [#allocation3 + $0x1], 1 }
 0x13b   :  { %452 = vsyncpa [#allocation6], 1 }
 0x13c   :  { %453 = vsyncpa [#allocation4], 1 }
 0x13d   :  { %455 = vsyncpa [#allocation4 + $0x1], 1 }

// kernel: deconv_block_forward.2
= control target key start
LH: loop header
LB: loop body
LE: loop exit
PB: predicated region body
PF: predicated region fallthrough
CT: control target
= control target key end

     0   :  { %s1753_s0 = inlined_call_operand.hbm [shape: bf16[2,16,16,128], index: 0, kind: input, shape index: {}]   ;;  %s1754_s1 = inlined_call_operand.hbm [shape: bf16[128,32], index: 1, kind: input, shape index: {}]   ;;  %s1755_s2 = inlined_call_operand.hbm [shape: f32[1,32], index: 2, kind: input, shape index: {}]   ;;  %s1756_s3 = inlined_call_operand.hbm [shape: f32[2,16,16,32], index: 3, kind: output, shape index: {0}]   ;;  %s1757_s4 = inlined_call_operand.hbm [shape: f32[2,2,2,32], index: 4, kind: output, shape index: {1}]  }
   0x1   :  { %1768 = sst [smem:[#allocation18_spill]] %s1754_s1 }
   0x2   :  { %1769 = sst [smem:[#allocation19_spill]] %s1755_s2 }
   0x3   :  { %1770 = sst [smem:[#allocation20_spill]] %s1757_s4 }
   0x4   :  { %10 = vsyncpa [#allocation3], 0 }
   0x5   :  { %12 = vsyncpa [#allocation3 + $0x1], 0 }
   0x6   :  { %13 = vsyncpa [#allocation6], 0 }
   0x7   :  { %14 = vsyncpa [#allocation4], 0 }
   0x8   :  { %16 = vsyncpa [#allocation4 + $0x1], 0 }
   0x9   :  { %17 = vsyncpa [#allocation10], 0 }
   0xa   :  { %19 = vsyncpa [#allocation10 + $0x1], 0  ;;  %s1291_s15 = smov 0   ;;  %s1293_s16 = smov 0  }
   0xb   :  { %s1295_s17 = smov 0   ;;  %s1297_s18 = smov 0  }
   0xc   :  { %s1299_s19 = smov 0   ;;  %s1301_s20 = smov 0  }
   0xd   :  { %s1303_s21 = smov 0   ;;  %s1305_s22 = smov 0  }
   0xe LB: > { %1771 = sst [smem:[#allocation15_spill]] %s1227_s15  ;;  %s801_s23 = sadd.s32 4294967295, %s1255_s22   ;;  %s1255_s22 = sphi %s1305_s22, %s25_s22   ;;  %s1251_s21 = sphi %s1303_s21, %s1802_s21   ;;  %s1247_s20 = sphi %s1301_s20, %s1801_s20   ;;  %s1243_s19 = sphi %s1299_s19, %s1800_s19   ;;  %s1239_s18 = sphi %s1297_s18, %s1799_s18   ;;  %s1235_s17 = sphi %s1295_s17, %s1798_s17   ;;  %s1231_s16 = sphi %s1293_s16, %s1797_s16   ;;  %s1227_s15 = sphi %s1291_s15, %s1796_s15  }
   0xf   : > { %s802_s24 = sadd.s32 4294967294, %s1255_s22   ;;  %p59_p0 = scmp.ne.s32.totalorder %s1231_s16, %s1227_s15 }
  0x10   : > { %p1335_p1 = scmp.eq.s32.totalorder %s801_s23, 0  ;;  %p1339_p2 = scmp.eq.s32.totalorder %s801_s23, 3 }
  0x11   : > { %p133_p3 = scmp.eq.s32.totalorder %s802_s24, 3  ;;  %p803_p5 = scmp.ge.s32.totalorder %s1255_s22, 1 }
  0x12   : > { %s1772_s25 = scalar_select %p1335_p1, 1, 0 }
  0x13   : > { %s1773_s26 = scalar_select %p1339_p2, 1, 0 }
  0x14   : > { %p1345_p4 = por %p1335_p1, %p59_p0  ;;  %p1350_p6 = por %p133_p3, %p59_p0 }
  0x15   : > { %p168_p7 = scmp.lt.s32.totalorder %s1255_s22, 5  ;;  %s1257_s30 = smov [#allocation5]  }
  0x16   : > { %s1774_s27 = scalar_select %p1345_p4, 1, 0 }
  0x17   : > { %s1775_s28 = scalar_select %p1350_p6, 1, 0 }
  0x18   : > { %p1355_p8 = pnand %p803_p5, %p168_p7  ;;  %s180_s5 = sshll.u32 %s1257_s30, 4  ;;  %s181_s5 = int_to_ptr.vmem [resolvable:$true] %s180_s5 }
  0x19   : > { %1776 = sst [smem:[#allocation16_spill]] %s1775_s28  ;;  %s1258_s7 = smov [#allocation7]  }
  0x1a   : > { %s1777_s29 = scalar_select %p1355_p8, 1, 0 }
  0x1b   : > { %p925_p9 = pneg %p1355_p8  ;;  %s194_s8 = sshll.u32 %s1258_s7, 4  ;;  %s1367_s8 = int_to_ptr.vmem [resolvable:$true] %s194_s8 }
  0x1c   : > { %s1779_s1 = sld [smem:[#allocation18_spill]] }
  0x1d   : > { %p1363_p10 = pnand %p925_p9, %p1335_p1 }
  0x1f   : > { %p1037_p12 = pneg %p1363_p10 }
  0x22   : > { %s1035_s11 = scalar_lea.hbm %s1779_s1, 1024 }
  0x23   : > { %p1036_p11 = scmp.ne.s32.totalorder %s1779_s1, %s1035_s11  ;;  %p1042_p3 = scmp.lt.u32.totalorder %s1035_s11, %s1779_s1 }
  0x25   : > { %p1038_p13 = pnand %p1037_p12, %p1036_p11 }
  0x27   : > { %p1039_p0 = pneg %p1038_p13 }
  0x29   : > { %p1044_p5 = pnand %p1042_p3, %p1039_p0 }
  0x2b   : > { %1047 = shalt.err (!%p1044_p5)
}
  0x2c   : > { %s1048_s24 = scalar_lea.vmem %s181_s5, 1024  ;;  %p1056_p1 = scmp.lt.s32.totalorder %s181_s5, %s181_s5 }
  0x2d   : > { %p1049_p7 = scmp.ne.s32.totalorder %s181_s5, %s1048_s24  ;;  %p1057_p4 = scmp.lt.s32.totalorder %s1048_s24, %s1048_s24 }
  0x2f   : > { %p1051_p9 = pnand %p1049_p7, %p1037_p12  ;;  %p1058_p8 = por %p1057_p4, %p1056_p1 }
  0x31   : > { %p1052_p6 = pneg %p1051_p9 }
  0x33   : > { %p1059_p2 = pnand %p1058_p8, %p1052_p6 }
  0x35   : > { %1062 = shalt.err (!%p1059_p2)
}
  0x36   : > { %s1763_s30 = smov 64   ;;  %s1764_s7 = smov 4  }
  0x37   : > { %928 = dma.hbm_to_vmem [thread:$0]  (!%p1363_p10), %s1779_s1, 1024, %s181_s5, [#allocation6], %s1763_s30, %s1763_s30, %s1764_s7  }
  0x38   : > { %s1780_s2 = sld [smem:[#allocation19_spill]] }
  0x3e   : > { %s1063_s13 = scalar_lea.hbm %s1780_s2, 16 }
  0x3f   : > { %p1064_p1 = scmp.ne.s32.totalorder %s1780_s2, %s1063_s13  ;;  %p1070_p6 = scmp.lt.u32.totalorder %s1063_s13, %s1780_s2 }
  0x41   : > { %p1066_p2 = pnand %p1064_p1, %p1037_p12 }
  0x43   : > { %p1067_p4 = pneg %p1066_p2 }
  0x45   : > { %p1072_p8 = pnand %p1070_p6, %p1067_p4 }
  0x47   : > { %1075 = shalt.err (!%p1072_p8)
}
  0x48   : > { %s1076_s5 = scalar_lea.vmem %s1367_s8, 16  ;;  %s1083_s9 = scalar_lea.vmem %s1367_s8, 32 }
  0x49   : > { %p1077_p11 = scmp.ne.s32.totalorder %s1367_s8, %s1076_s5  ;;  %p1084_p3 = scmp.lt.s32.totalorder %s1367_s8, %s1367_s8 }
  0x4a   : > { %p1085_p5 = scmp.lt.s32.totalorder %s1083_s9, %s1076_s5 }
  0x4b   : > { %p1079_p13 = pnand %p1077_p11, %p1037_p12 }
  0x4c   : > { %p1086_p7 = por %p1085_p5, %p1084_p3 }
  0x4d   : > { %p1080_p0 = pneg %p1079_p13 }
  0x4f   : > { %p1087_p9 = pnand %p1086_p7, %p1080_p0 }
  0x51   : > { %1090 = shalt.err (!%p1087_p9)
}
  0x52   : > { %931 = dma.hbm_to_vmem [thread:$0]  (!%p1363_p10), %s1780_s2, 16, %s1367_s8, [#allocation6]  }
  0x53   : > { %s34_s11 = sadd.s32 1, %s1247_s20  ;;  %s37_s12 = sadd.s32 1, %s1251_s21 }
  0x54   : > { %p35_p12 = scmp.ge.s32.totalorder %s34_s11, 2  ;;  %s46_s6 = sadd.s32 1, %s1235_s17 }
  0x55   : > { %p53_p1 = scmp.ne.s32.totalorder %s1235_s17, %s1231_s16  ;;  %p54_p2 = scmp.eq.s32.totalorder %s1255_s22, 0 }
  0x56   : > { %s1804_s11 = smov (%p35_p12, %s34_s11), 0  ;;  %s1806_s12 = smov (!%p35_p12, %s37_s12), %s1251_s21 }
  0x57   : > { %1781 = sst [smem:[#allocation17_spill]] %s1804_s11  ;;  %s42_s13 = ssub.s32 %s1247_s20, %s1804_s11 }
  0x58   : > { %p1431_p4 = por %p54_p2, %p53_p1  ;;  %p39_p10 = scmp.ge.s32.totalorder %s1806_s12, 2 }
  0x59   : > { %p1783_p6 = scmp.ne.s32.totalorder %s1773_s26, 0  ;;  %p945_p11 = scmp.lt.s32.totalorder %s1255_s22, 4 }
  0x5a   : > { %s205_s23 = sand.u32 1, %s1235_s17   ;;  %s1808_s12 = smov (%p39_p10, %s1806_s12), 0 }
  0x5b   : > { %p1437_p8 = por %p1783_p6, %p53_p1  ;;  %s807_s24 = sshll.u32 %s205_s23, 6 }
  0x5c   : > { %s41_s5 = ssub.s32 %s1251_s21, %s1808_s12  ;;  %s845_s28 = sshll.u32 %s1247_s20, 4 }
  0x5d   : > { %s43_s9 = sor.u32 %s42_s13, %s41_s5  ;;  %s810_s10 = sshll.u32 %s1251_s21, 5 }
  0x5e   : > { %p44_p13 = scmp.eq.s32.totalorder %s43_s9, 0  ;;  %s216_s30 = sadd.s32 %s845_s28, %s810_s10 }
  0x5f   : > { %s209_s7 = scalar_lea.vmem [#allocation2], %s807_s24  ;;  %s811_s2 = sshll.u32 %s216_s30, 6 }
  0x60   : > { %s219_s26 = sshll.u32 %s209_s7, 4  ;;  %s1457_s4 = scalar_lea.hbm %s1753_s0, %s811_s2  ;;  %s1452_s26 = int_to_ptr.vmem [resolvable:$true] %s219_s26 }
  0x61   : > { %s1450_s1 = scalar_select %p44_p13, %s1235_s17, %s46_s6  }
  0x62   : > { %p1463_p0 = pnand %p945_p11, %p1431_p4  ;;  %s1467_s30 = scalar_lea.sflag [#allocation3], %s205_s23 }
  0x63   : > { %s1091_s7 = scalar_lea.hbm %s1457_s4, 1024  ;;  %s1096_s11 = scalar_lea.hbm %s1753_s0, 4096 }
  0x64   : > { %p1092_p3 = scmp.ne.s32.totalorder %s1457_s4, %s1091_s7  ;;  %p1093_p5 = pneg %p1463_p0 }
  0x65   : > { %p1097_p12 = scmp.lt.u32.totalorder %s1457_s4, %s1753_s0  ;;  %p1098_p1 = scmp.lt.u32.totalorder %s1096_s11, %s1091_s7 }
  0x66   : > { %p1094_p7 = pnand %p1093_p5, %p1092_p3  ;;  %p1100_p4 = scmp.lt.u32.totalorder %s1091_s7, %s1457_s4 }
  0x67   : > { %p1099_p2 = por %p1098_p1, %p1097_p12 }
  0x68   : > { %p1095_p9 = pneg %p1094_p7 }
  0x69   : > { %p1101_p10 = por %p1100_p4, %p1099_p2 }
  0x6b   : > { %p1102_p6 = pnand %p1101_p10, %p1095_p9 }
  0x6d   : > { %1105 = shalt.err (!%p1102_p6)
}
  0x6e   : > { %s1106_s23 = scalar_lea.vmem %s1452_s26, 1024  ;;  %s1261_s24 = smov [#allocation2]  }
  0x6f   : > { %p1107_p11 = scmp.ne.s32.totalorder %s1452_s26, %s1106_s23  ;;  %s1111_s5 = sshll.u32 %s1261_s24, 4  ;;  %s1112_s5 = int_to_ptr.vmem [resolvable:$false] %s1111_s5 }
  0x70   : > { %s1113_s9 = scalar_lea.vmem %s1112_s5, 2048  ;;  %p1114_p7 = scmp.lt.s32.totalorder %s1452_s26, %s1112_s5 }
  0x71   : > { %p1109_p13 = pnand %p1107_p11, %p1093_p5  ;;  %p1115_p12 = scmp.lt.s32.totalorder %s1113_s9, %s1106_s23 }
  0x73   : > { %p1110_p3 = pneg %p1109_p13  ;;  %p1116_p1 = por %p1115_p12, %p1114_p7 }
  0x75   : > { %p1117_p2 = pnand %p1116_p1, %p1110_p3 }
  0x77   : > { %1120 = shalt.err (!%p1117_p2)
}
  0x78   : > { %s1786_s28 = smov 4   ;;  %s1787_s10 = smov 64  }
  0x79   : > { %935 = dma.hbm_to_vmem [thread:$0]  (!%p1463_p0), %s1457_s4, 1024, %s1452_s26, %s1467_s30, %s1787_s10, %s1787_s10, %s1786_s28  }
  0x7a   : > { %p1788_p5 = scmp.ne.s32.totalorder %s1777_s29, 0 }
  0x7b   : > { %s1501_s7 = sand.u32 (!%p1788_p5), 1, %s1231_s16   ;;  %p1789_p9 = scmp.ne.s32.totalorder (!%p1788_p5), %s1774_s27, 0 }
  0x7c   : > { %231 = sbr.rel (%p1788_p5) target bundleno = 457 (0x1c9), region = 32  ;;  %s813_s2 = sshll.u32 (!%p1788_p5), %s1501_s7, 6 }
  0x7d   : > { %s234_s15 = scalar_lea.sflag (!%p1788_p5), [#allocation3], %s1501_s7  ;;  %s1505_s11 = scalar_lea.vmem (!%p1788_p5), [#allocation2], %s813_s2 }
  0x83   : > { %1210 = dma.done.wait (%p1789_p9), %s234_s15, 1024  }
  0x84   : > { %1212 = vsyncadd (%p1789_p9), %s234_s15, 4294966272  ;;  %p1790_p0 = scmp.ne.s32.totalorder %s1772_s25, 0 }
  0x86   : > { %1214 = dma.done.wait (%p1790_p0), [#allocation6], 1040  }
  0x87   : > { %1216 = vsyncadd (%p1790_p0), [#allocation6], 4294966256  ;;  %v1019_v0 = vld [vmem:[#allocation5] sm:$0xff]   ;;  %v1020_v1 = vld [vmem:[#allocation5 + $0x8] sm:$0xff]   ;;  %s816_s4 = sshll.u32 %s1501_s7, 7  ;;  %vm510_vm0 = vcmask 261120  }
  0x88   : > { %863 = vmatprep.subr.bf16.mxu0 %v1019_v0  ;;  %895 = vmatprep.subr.bf16.mxu1 %v1019_v0  ;;  %v1021_v2 = vld [vmem:[#allocation5 + $0x10] sm:$0xff]   ;;  %v1022_v3 = vld [vmem:[#allocation5 + $0x18] sm:$0xff]   ;;  %v1027_v4 = vld [vmem:[%s1505_s11] sm:$0xff]   ;;  %s1534_s25 = scalar_lea.vmem [#allocation8], %s816_s4  ;;  %s846_s27 = sshll.u32 %s1239_s18, 4 }
  0x89   : > { %864 = vmatpush3.bf16.msra.mxu0 %v1019_v0  ;;  %903 = vmatpush3.bf16.msra.mxu1 %v1019_v0  ;;  %v1023_v5 = vld [vmem:[#allocation5 + $0x20] sm:$0xff]   ;;  %v1024_v7 = vld [vmem:[#allocation5 + $0x28] sm:$0xff]   ;;  %v1025_v8 = vld [vmem:[#allocation5 + $0x30] sm:$0xff]   ;;  %s839_s29 = sshll.u32 %s1243_s19, 5  ;;  %s643_s13 = sshll.u32 %s1534_s25, 4  ;;  %s1605_s13 = int_to_ptr.vmem [resolvable:$true] %s643_s13 }
  0x8a   : > { %865 = vmatprep.subr.bf16.mxu0 %v1020_v1  ;;  %896 = vmatprep.subr.bf16.mxu1 %v1020_v1  ;;  %v1031_v6 = vld [vmem:[%s1505_s11 + $0x20] sm:$0xff]   ;;  %v1026_v9 = vld [vmem:[#allocation5 + $0x38] sm:$0xff]   ;;  %v1028_v10 = vld [vmem:[%s1505_s11 + $0x8] sm:$0xff]   ;;  %s1578_s26 = sadd.s32 %s846_s27, %s839_s29  ;;  %s622_s24 = scalar_lea.sflag [#allocation4], %s1501_s7 }
  0x8b   : > { %879 = vmatprep.mubr.bf16.mxu0 %v1027_v4  ;;  %887 = vmatprep.mubr.bf16.mxu1 %v1031_v6  ;;  %v1032_v11 = vld [vmem:[%s1505_s11 + $0x28] sm:$0xff]   ;;  %v1029_v12 = vld [vmem:[%s1505_s11 + $0x10] sm:$0xff]   ;;  %v1030_v14 = vld [vmem:[%s1505_s11 + $0x18] sm:$0xff]   ;;  %s840_s30 = sshll.u32 %s1578_s26, 7  ;;  %s1121_s5 = scalar_lea.vmem %s1605_s13, 2048 }
  0x8c   : > { %v1033_v13 = vld [vmem:[%s1505_s11 + $0x30] sm:$0xff]   ;;  %v1034_v15 = vld [vmem:[%s1505_s11 + $0x38] sm:$0xff]   ;;  %v1524_v16 = vld [vmem:[#allocation7] ss:$0 sm:$0xff]  ;;  %s1614_s23 = scalar_lea.hbm %s1756_s3, %s840_s30  ;;  %p1122_p4 = scmp.ne.s32.totalorder %s1605_s13, %s1121_s5 }
  0x8d   : > { %866 = vmatpush3.bf16.msra.mxu0 %v1020_v1  ;;  %904 = vmatpush3.bf16.msra.mxu1 %v1020_v1  ;;  %s1262_s9 = smov [#allocation8]  }
  0x8e   : > { %867 = vmatprep.subr.bf16.mxu0 %v1021_v2  ;;  %897 = vmatprep.subr.bf16.mxu1 %v1021_v2  ;;  %p1123_p10 = pnand %p1122_p4, %p1437_p8  ;;  %s1125_s28 = sshll.u32 %s1262_s9, 4  ;;  %s1126_s28 = int_to_ptr.vmem [resolvable:$false] %s1125_s28 }
  0x8f   : > { %s1127_s10 = scalar_lea.vmem %s1126_s28, 4096  ;;  %p1128_p11 = scmp.lt.s32.totalorder %s1605_s13, %s1126_s28 }
  0x90   : > { %p1124_p6 = pneg %p1123_p10  ;;  %p1129_p13 = scmp.lt.s32.totalorder %s1127_s10, %s1121_s5 }
  0x91   : > { %868 = vmatpush3.bf16.msra.mxu0 %v1021_v2  ;;  %905 = vmatpush3.bf16.msra.mxu1 %v1021_v2 }
  0x92   : > { %869 = vmatprep.subr.bf16.mxu0 %v1022_v3  ;;  %898 = vmatprep.subr.bf16.mxu1 %v1022_v3  ;;  %p1130_p3 = por %p1129_p13, %p1128_p11 }
  0x94   : > { %p1131_p7 = pnand %p1130_p3, %p1124_p6 }
  0x95   : > { %870 = vmatpush3.bf16.msra.mxu0 %v1022_v3  ;;  %906 = vmatpush3.bf16.msra.mxu1 %v1022_v3 }
  0x96   : > { %871 = vmatprep.subr.bf16.mxu0 %v1023_v5  ;;  %899 = vmatprep.subr.bf16.mxu1 %v1023_v5 }
  0x99   : > { %872 = vmatpush3.bf16.msra.mxu0 %v1023_v5  ;;  %907 = vmatpush3.bf16.msra.mxu1 %v1023_v5 }
  0x9a   : > { %873 = vmatprep.subr.bf16.mxu0 %v1024_v7  ;;  %900 = vmatprep.subr.bf16.mxu1 %v1024_v7 }
  0x9d   : > { %874 = vmatpush3.bf16.msra.mxu0 %v1024_v7  ;;  %908 = vmatpush3.bf16.msra.mxu1 %v1024_v7 }
  0x9e   : > { %875 = vmatprep.subr.bf16.mxu0 %v1025_v8  ;;  %901 = vmatprep.subr.bf16.mxu1 %v1025_v8 }
  0xa1   : > { %876 = vmatpush3.bf16.msra.mxu0 %v1025_v8  ;;  %909 = vmatpush3.bf16.msra.mxu1 %v1025_v8 }
  0xa2   : > { %877 = vmatprep.subr.bf16.mxu0 %v1026_v9  ;;  %902 = vmatprep.subr.bf16.mxu1 %v1026_v9 }
  0xa5   : > { %878 = vmatpush3.bf16.msra.mxu0 %v1026_v9  ;;  %910 = vmatpush3.bf16.msra.mxu1 %v1026_v9 }
  0xa8   : > { %880 = vmatmul.mubr.bf16.vlgmr.msra.gmra.mrb[0].mxu0 %v1028_v10  ;;  %888 = vmatmul.mubr.bf16.vlgmr.msra.gmra.mrb[0].mxu1 %v1032_v11 }
  0xa9   : > { %883 = vmatprep.mubr.bf16.mxu0 %v1029_v12  ;;  %891 = vmatprep.mubr.bf16.mxu1 %v1033_v13 }
  0xb0   : > { %884 = vmatmul.mubr.bf16.gmra.mrb[4].mxu0 %v1030_v14  ;;  %892 = vmatmul.mubr.bf16.gmra.mrb[4].mxu1 %v1034_v15 }
 0x17b   : > { %v881_v17 = vpop.f32.mrb[0].mxu0  ;;  %v889_v18 = vpop.f32.mrb[0].mxu1 }
 0x17c   : > { %v456_v19 = vadd.f32 %v881_v17, %v1524_v16  ;;  %v447_v20 = vpop.f32.mrb[1].mxu0  ;;  %v1528_v21 = vadd.f32 %v889_v18, %v1524_v16  ;;  %v479_v22 = vpop.f32.mrb[1].mxu1 }
 0x17d   : > { %v448_v23 = vadd.f32 %v1524_v16, %v447_v20  ;;  %v882_v24 = vpop.f32.mrb[2].mxu0  ;;  %v1532_v25 = vadd.f32 %v1524_v16, %v479_v22  ;;  %v890_v26 = vpop.f32.mrb[2].mxu1 }
 0x17e   : > { %513 = vst.msk [vmem:[%s1534_s25 + $0x10] sm:$0xff] %vm510_vm0, %v456_v19  ;;  %v459_v27 = vadd.f32 %v882_v24, %v1524_v16  ;;  %v450_v28 = vpop.f32.mrb[3].mxu0  ;;  %521 = vst.msk [vmem:[%s1534_s25 + $0x50] sm:$0xff] %vm510_vm0, %v1528_v21  ;;  %v482_v29 = vpop.f32.mrb[3].mxu1  ;;  %v566_v32 = vmul.f32 %v456_v19, %v456_v19  ;;  %v1555_v38 = vadd.f32 %v890_v26, %v1524_v16  ;;  %v530_v39 = vsel %vm510_vm0, %v456_v19, 0.0 }
 0x17f   : > { %511 = vst.msk [vmem:[%s1534_s25] sm:$0xff] %vm510_vm0, %v448_v23  ;;  %v564_v30 = vmul.f32 %v448_v23, %v448_v23  ;;  %v451_v31 = vadd.f32 %v1524_v16, %v450_v28  ;;  %519 = vst.msk [vmem:[%s1534_s25 + $0x40] sm:$0xff] %vm510_vm0, %v1532_v25  ;;  %v527_v33 = vsel %vm510_vm0, %v448_v23, 0.0  ;;  %v1562_v43 = vadd.f32 %v1524_v16, %v482_v29 }
 0x180   : > { %514 = vst.msk [vmem:[%s1534_s25 + $0x18] sm:$0xff] %vm510_vm0, %v459_v27  ;;  %v567_v36 = vmul.f32 %v459_v27, %v459_v27  ;;  %522 = vst.msk [vmem:[%s1534_s25 + $0x58] sm:$0xff] %vm510_vm0, %v1555_v38  ;;  %v583_v50 = vsel %vm510_vm0, %v566_v32, 0.0  ;;  %v532_v51 = vsel %vm510_vm0, %v459_v27, 0.0  ;;  %v572_v4 = vmul.f32 %v1532_v25, %v1532_v25 }
 0x181   : > { %512 = vst.msk [vmem:[%s1534_s25 + $0x8] sm:$0xff] %vm510_vm0, %v451_v31  ;;  %v528_v34 = vsel %vm510_vm0, %v451_v31, 0.0  ;;  %v565_v35 = vmul.f32 %v451_v31, %v451_v31  ;;  %v580_v40 = vsel %vm510_vm0, %v564_v30, 0.0  ;;  %520 = vst.msk [vmem:[%s1534_s25 + $0x48] sm:$0xff] %vm510_vm0, %v1562_v43  ;;  %v542_v20 = vsel %vm510_vm0, %v1532_v25, 0.0 }
 0x182   : > { %v529_v37 = vadd.f32 %v528_v34, %v527_v33  ;;  %v585_v55 = vsel %vm510_vm0, %v567_v36, 0.0 }
 0x183   : > { %v581_v41 = vsel %vm510_vm0, %v565_v35, 0.0  ;;  %v885_v42 = vpop.f32.mrb[4].mxu0  ;;  %v893_v44 = vpop.f32.mrb[4].mxu1 }
 0x184   : > { %v531_v45 = vadd.f32 %v530_v39, %v529_v37  ;;  %v582_v46 = vadd.f32 %v581_v41, %v580_v40  ;;  %v472_v47 = vadd.f32 %v885_v42, %v1524_v16  ;;  %v463_v48 = vpop.f32.mrb[5].mxu0  ;;  %v495_v49 = vpop.f32.mrb[5].mxu1  ;;  %v1597_v10 = vadd.f32 %v893_v44, %v1524_v16 }
 0x185   : > { %v464_v52 = vadd.f32 %v1524_v16, %v463_v48  ;;  %v886_v53 = vpop.f32.mrb[6].mxu0  ;;  %v894_v54 = vpop.f32.mrb[6].mxu1  ;;  %v1600_v11 = vadd.f32 %v1524_v16, %v495_v49 }
 0x186   : > { %v584_v56 = vadd.f32 %v583_v50, %v582_v46  ;;  %517 = vst.msk [vmem:[%s1534_s25 + $0x30] sm:$0xff] %vm510_vm0, %v472_v47  ;;  %v533_v57 = vadd.f32 %v532_v51, %v531_v45  ;;  %v466_v58 = vpop.f32.mrb[7].mxu0  ;;  %v498_v59 = vpop.f32.mrb[7].mxu1  ;;  %v475_v62 = vadd.f32 %v886_v53, %v1524_v16  ;;  %v570_v5 = vmul.f32 %v472_v47, %v472_v47 }
 0x187   : > { %515 = vst.msk [vmem:[%s1534_s25 + $0x20] sm:$0xff] %vm510_vm0, %v464_v52  ;;  %v534_v60 = vsel %vm510_vm0, %v464_v52, 0.0  ;;  %v568_v61 = vmul.f32 %v464_v52, %v464_v52  ;;  %v467_v63 = vadd.f32 %v1524_v16, %v466_v58  ;;  %v538_v9 = vsel %vm510_vm0, %v472_v47, 0.0  ;;  %525 = vst.msk [vmem:[%s1534_s25 + $0x70] sm:$0xff] %vm510_vm0, %v1597_v10 }
 0x188   : > { %v535_v0 = vadd.f32 %v534_v60, %v533_v57  ;;  %v586_v1 = vadd.f32 %v585_v55, %v584_v56  ;;  %518 = vst.msk [vmem:[%s1534_s25 + $0x38] sm:$0xff] %vm510_vm0, %v475_v62  ;;  %v1603_v12 = vadd.f32 %v894_v54, %v1524_v16  ;;  %v571_v13 = vmul.f32 %v475_v62, %v475_v62 }
 0x189   : > { %v587_v2 = vsel %vm510_vm0, %v568_v61, 0.0  ;;  %516 = vst.msk [vmem:[%s1534_s25 + $0x28] sm:$0xff] %vm510_vm0, %v467_v63  ;;  %v536_v3 = vsel %vm510_vm0, %v467_v63, 0.0  ;;  %v569_v8 = vmul.f32 %v467_v63, %v467_v63  ;;  %v1609_v17 = vadd.f32 %v1524_v16, %v498_v59  ;;  %523 = vst.msk [vmem:[%s1534_s25 + $0x60] sm:$0xff] %vm510_vm0, %v1600_v11 }
 0x18a   : > { %v588_v6 = vadd.f32 %v587_v2, %v586_v1  ;;  %v537_v7 = vadd.f32 %v536_v3, %v535_v0  ;;  %v540_v18 = vsel %vm510_vm0, %v475_v62, 0.0  ;;  %526 = vst.msk [vmem:[%s1534_s25 + $0x78] sm:$0xff] %vm510_vm0, %v1603_v12  ;;  %v591_v16 = vsel %vm510_vm0, %v570_v5, 0.0 }
 0x18b   : > { %v589_v15 = vsel %vm510_vm0, %v569_v8, 0.0  ;;  %524 = vst.msk [vmem:[%s1534_s25 + $0x68] sm:$0xff] %vm510_vm0, %v1609_v17 }
 0x18c   : > { %v539_v14 = vadd.f32 %v538_v9, %v537_v7  ;;  %v590_v19 = vadd.f32 %v589_v15, %v588_v6 }
 0x18e   : > { %v541_v22 = vadd.f32 %v540_v18, %v539_v14  ;;  %v592_v23 = vadd.f32 %v591_v16, %v590_v19 }
 0x18f   : > { %1134 = shalt.err (!%p1131_p7)
}
 0x190   : > { %s1135_s2 = scalar_lea.hbm %s1614_s23, 2048  ;;  %s1139_s4 = scalar_lea.hbm %s1756_s3, 8192 }
 0x191   : > { %p1136_p12 = scmp.ne.s32.totalorder %s1614_s23, %s1135_s2  ;;  %p1140_p5 = scmp.lt.u32.totalorder %s1614_s23, %s1756_s3 }
 0x192   : > { %p1141_p9 = scmp.lt.u32.totalorder %s1139_s4, %s1135_s2  ;;  %p1143_p4 = scmp.lt.u32.totalorder %s1135_s2, %s1614_s23 }
 0x193   : > { %p1137_p1 = pnand %p1136_p12, %p1437_p8 }
 0x194   : > { %p1142_p0 = por %p1141_p9, %p1140_p5 }
 0x195   : > { %p1138_p2 = pneg %p1137_p1 }
 0x196   : > { %p1144_p10 = por %p1143_p4, %p1142_p0 }
 0x198   : > { %p1145_p6 = pnand %p1144_p10, %p1138_p2 }
 0x19a   : > { %1148 = shalt.err (!%p1145_p6)
}
 0x19b   : > { %s1263_s29 = smov 128   ;;  %s1264_s26 = smov 8   ;;  %v593_v24 = vsel %vm510_vm0, %v571_v13, 0.0  ;;  %v543_v25 = vadd.f32 %v542_v20, %v541_v22  ;;  %v595_v26 = vsel %vm510_vm0, %v572_v4, 0.0  ;;  %v573_v27 = vmul.f32 %v1562_v43, %v1562_v43 }
 0x19c   : > { %921 = dma.vmem_to_hbm [thread:$0]  (%p1437_p8), %s1605_s13, 2048, %s1614_s23, %s622_s24, %s1263_s29, %s1263_s29, %s1264_s26   ;;  %v594_v28 = vadd.f32 %v593_v24, %v592_v23  ;;  %v544_v29 = vsel %vm510_vm0, %v1562_v43, 0.0  ;;  %v574_v30 = vmul.f32 %v1528_v21, %v1528_v21  ;;  %v546_v32 = vsel %vm510_vm0, %v1528_v21, 0.0 }
 0x19d   : > { %v545_v31 = vadd.f32 %v544_v29, %v543_v25  ;;  %v575_v34 = vmul.f32 %v1555_v38, %v1555_v38  ;;  %v597_v36 = vsel %vm510_vm0, %v573_v27, 0.0  ;;  %v576_v37 = vmul.f32 %v1600_v11, %v1600_v11  ;;  %s817_s13 = sshll.u32 %s1501_s7, 1  ;;  %s841_s30 = sshll.u32 %s1243_s19, 1 }
 0x19e   : > { %v596_v33 = vadd.f32 %v595_v26, %v594_v28  ;;  %v548_v39 = vsel %vm510_vm0, %v1555_v38, 0.0  ;;  %v550_v41 = vsel %vm510_vm0, %v1600_v11, 0.0  ;;  %v599_v42 = vsel %vm510_vm0, %v574_v30, 0.0  ;;  %s657_s6 = sadd.s32 %s1239_s18, %s841_s30  ;;  %s274_s23 = scalar_lea.vmem [#allocation9], %s817_s13 }
 0x19f   : > { %v547_v35 = vadd.f32 %v546_v32, %v545_v31  ;;  %v601_v44 = vsel %vm510_vm0, %v575_v34, 0.0  ;;  %v603_v46 = vsel %vm510_vm0, %v576_v37, 0.0  ;;  %v577_v47 = vmul.f32 %v1609_v17, %v1609_v17  ;;  %s842_s14 = sshll.u32 %s657_s6, 5  ;;  %s661_s24 = sshll.u32 %s274_s23, 4  ;;  %s1701_s24 = int_to_ptr.vmem [resolvable:$true] %s661_s24 }
 0x1a0   : > { %v598_v40 = vadd.f32 %v597_v36, %v596_v33  ;;  %v552_v38 = vsel %vm510_vm0, %v1609_v17, 0.0  ;;  %v578_v49 = vmul.f32 %v1597_v10, %v1597_v10  ;;  %v554_v51 = vsel %vm510_vm0, %v1597_v10, 0.0  ;;  %s1791_s28 = sld [smem:[#allocation20_spill]]  ;;  %s627_s18 = scalar_lea.sflag [#allocation10], %s1501_s7 }
 0x1a1   : > { %v549_v21 = vadd.f32 %v548_v39, %v547_v35  ;;  %v579_v53 = vmul.f32 %v1603_v12, %v1603_v12  ;;  %v605_v55 = vsel %vm510_vm0, %v577_v47, 0.0  ;;  %v556_v56 = vsel %vm510_vm0, %v1603_v12, 0.0  ;;  %s1149_s19 = scalar_lea.vmem %s1701_s24, 32  ;;  %s1265_s2 = smov [#allocation9]  }
 0x1a2   : > { %v600_v43 = vadd.f32 %v599_v42, %v598_v40  ;;  %v607_v58 = vsel %vm510_vm0, %v578_v49, 0.0  ;;  %vm617_vm1 = vcmask 1040384   ;;  %vm619_vm2 = vcmask 254976   ;;  %p1150_p11 = scmp.ne.s32.totalorder %s1701_s24, %s1149_s19  ;;  %s1153_s15 = sshll.u32 %s1265_s2, 4  ;;  %s1154_s15 = int_to_ptr.vmem [resolvable:$false] %s1153_s15 }
 0x1a3   : > { %v551_v45 = vadd.f32 %v550_v41, %v549_v21  ;;  %v609_v61 = vsel %vm510_vm0, %v579_v53, 0.0  ;;  %s1155_s11 = scalar_lea.vmem %s1154_s15, 64  ;;  %p1156_p7 = scmp.lt.s32.totalorder %s1701_s24, %s1154_s15 }
 0x1a4   : > { %v602_v48 = vadd.f32 %v601_v44, %v600_v43  ;;  %p1151_p13 = pnand %p1150_p11, %p1437_p8  ;;  %p1157_p12 = scmp.lt.s32.totalorder %s1155_s11, %s1149_s19 }
 0x1a5   : > { %v553_v50 = vadd.f32 %v552_v38, %v551_v45 }
 0x1a6   : > { %v604_v52 = vadd.f32 %v603_v46, %v602_v48  ;;  %s1699_s10 = scalar_lea.hbm %s1791_s28, %s842_s14  ;;  %p1152_p3 = pneg %p1151_p13 }
 0x1a7   : > { %v555_v54 = vadd.f32 %v554_v51, %v553_v50  ;;  %p1158_p1 = por %p1157_p12, %p1156_p7 }
 0x1a8   : > { %v606_v57 = vadd.f32 %v605_v55, %v604_v52 }
 0x1a9   : > { %v557_v59 = vadd.f32 %v556_v56, %v555_v54  ;;  %p1159_p2 = pnand %p1158_p1, %p1152_p3 }
 0x1aa   : > { %v608_v60 = vadd.f32 %v607_v58, %v606_v57 }
 0x1ab   : > { %v558_v62 = vrot.slane %v557_v59, 4 }
 0x1ac   : > { %v610_v63 = vadd.f32 %v609_v61, %v608_v60 }
 0x1ad   : > { %v559_v0 = vadd.f32 %v558_v62, %v557_v59 }
 0x1ae   : > { %v611_v1 = vrot.slane %v610_v63, 4 }
 0x1af   : > { %v560_v2 = vrot.slane %v559_v0, 2 }
 0x1b0   : > { %v612_v3 = vadd.f32 %v611_v1, %v610_v63 }
 0x1b1   : > { %v561_v4 = vadd.f32 %v560_v2, %v559_v0 }
 0x1b2   : > { %v613_v5 = vrot.slane %v612_v3, 2 }
 0x1b3   : > { %v562_v6 = vrot.slane %v561_v4, 1 }
 0x1b4   : > { %v614_v7 = vadd.f32 %v613_v5, %v612_v3 }
 0x1b5   : > { %v563_v9 = vadd.f32 %v562_v6, %v561_v4 }
 0x1b6   : > { %v615_v8 = vrot.slane %v614_v7, 1 }
 0x1b8   : > { %v616_v10 = vadd.f32 %v615_v8, %v614_v7 }
 0x1ba   : > { %v618_v11 = vsel %vm617_vm1, %v563_v9, %v616_v10 }
 0x1bb   : > { %620 = vst.msk [vmem:[%s274_s23] sm:$0x3] %vm619_vm2, %v618_v11 }
 0x1bc   : > { %1162 = shalt.err (!%p1159_p2)
}
 0x1bd   : > { %s1163_s7 = scalar_lea.hbm %s1699_s10, 32  ;;  %s1167_s27 = scalar_lea.hbm %s1791_s28, 128 }
 0x1be   : > { %p1164_p5 = scmp.ne.s32.totalorder %s1699_s10, %s1163_s7  ;;  %p1168_p4 = scmp.lt.u32.totalorder %s1699_s10, %s1791_s28 }
 0x1bf   : > { %p1169_p10 = scmp.lt.u32.totalorder %s1167_s27, %s1163_s7  ;;  %p1171_p11 = scmp.lt.u32.totalorder %s1163_s7, %s1699_s10 }
 0x1c0   : > { %p1165_p9 = pnand %p1164_p5, %p1437_p8 }
 0x1c1   : > { %p1170_p6 = por %p1169_p10, %p1168_p4 }
 0x1c2   : > { %p1166_p0 = pneg %p1165_p9 }
 0x1c3   : > { %p1172_p13 = por %p1171_p11, %p1170_p6 }
 0x1c5   : > { %p1173_p3 = pnand %p1172_p13, %p1166_p0 }
 0x1c7   : > { %1176 = shalt.err (!%p1173_p3)
}
 0x1c8   : > { %922 = dma.vmem_to_hbm [thread:$0]  (%p1437_p8), %s1701_s24, 32, %s1699_s10, %s627_s18  }
 0x1c9 PF: > { %s1792_s13 = sld [smem:[#allocation15_spill]]  ;;  %s1793_s30 = sld [smem:[#allocation16_spill]] }
 0x1ca   : > { %p948_p7 = scmp.ge.s32.totalorder %s1255_s22, 2 }
 0x1cf   : > { %s673_s6 = sand.u32 1, %s1792_s13   ;;  %p1794_p12 = scmp.ne.s32.totalorder %s1793_s30, 0 }
 0x1d0   : > { %s674_s14 = scalar_lea.sflag [#allocation4], %s673_s6 }
 0x1d1   : > { %p937_p1 = pnand %p948_p7, %p1794_p12 }
 0x1d3   : > { %1218 = dma.done.wait (!%p937_p1), %s674_s14, 2048  }
 0x1d4   : > { %1220 = vsyncadd (!%p937_p1), %s674_s14, 4294965248  ;;  %s683_s23 = scalar_lea.sflag [#allocation10], %s673_s6 }
 0x1d5   : > { %1222 = dma.done.wait (!%p937_p1), %s683_s23, 32  }
 0x1d6   : > { %1224 = vsyncadd (!%p937_p1), %s683_s23, 4294967264  ;;  %s25_s22 = sadd.s32 1, %s1255_s22   ;;  %s1795_s8 = sld [smem:[#allocation17_spill]] }
 0x1d7   : > { %p22_p2 = scmp.ge.s32.totalorder %s25_s22, 6   ;;  %s1796_s15 = smov %s1231_s16 }
 0x1d8   : > { %s1797_s16 = smov %s1235_s17  ;;  %s1798_s17 = smov %s1450_s1 }
 0x1d9   : > { %s1799_s18 = smov %s1247_s20  ;;  %s1800_s19 = smov %s1251_s21 }
 0x1da   : > { %s1802_s21 = smov %s1808_s12  ;;  %24 = sbr.rel (!%p22_p2) target bundleno = 14 (0xe), region = 102 }
 0x1dc   : > { %s1801_s20 = smov %s1795_s8 }
 0x1e1   :  { %688 = vsyncpa [#allocation3], 1 }
 0x1e2   :  { %690 = vsyncpa [#allocation3 + $0x1], 1 }
 0x1e3   :  { %691 = vsyncpa [#allocation6], 1 }
 0x1e4   :  { %692 = vsyncpa [#allocation4], 1 }
 0x1e5   :  { %694 = vsyncpa [#allocation4 + $0x1], 1 }
 0x1e6   :  { %695 = vsyncpa [#allocation10], 1 }
 0x1e7   :  { %697 = vsyncpa [#allocation10 + $0x1], 1 }

</bundles_post_ra>
